<compile_context>
chip_gen: v5e
topology: v5e:2x2
jax: 0.10.0
libtpu: 0.0.40
codegen_flags: <defaults>
</compile_context>

<pallas_src>
import functools

import jax
import jax.numpy as jnp
from jax.experimental import pallas as pl
from jax.experimental.pallas import tpu as pltpu

LANE = 128
# Explicit scoped-VMEM budget: generous, but below v7x's 64 MiB physical VMEM
# and far above what our in-flight tiles actually use (a few MiB).
_VMEM_LIMIT_BYTES = 48 * 1024 * 1024
# Keep the H panel fully VMEM-resident (constant index_map) below this size.
_RESIDENT_H_BYTES = 4 * 1024 * 1024


def _round_up(x, m):
    return (x + m - 1) // m * m


def _pick_tile(dim, candidates, max_tile=None):
    for t in candidates:
        if max_tile is not None and t > max_tile:
            continue
        if dim >= t and dim % t == 0:
            return t
    return dim


def _pad2(x, rows, cols):
    r, c = x.shape
    return jnp.pad(x, ((0, rows - r), (0, cols - c)))


# ---------------------------------------------------------------------------
# Pallas kernels
# ---------------------------------------------------------------------------

def _gcn_layer_kernel(a_ref, h_ref, w_ref, b_ref, o_ref, acc_ref, *,
                      apply_relu, resident_h, tk):
    """Multi-step reduction: acc += A_tile @ H_tile; finalize: relu(acc@W + b)."""
    kk = pl.program_id(1)

    @pl.when(kk == 0)
    def _():
        acc_ref[...] = jnp.zeros_like(acc_ref)

    if resident_h:
        start = pl.multiple_of(kk * tk, tk)
        h_blk = h_ref[pl.ds(start, tk), :]
    else:
        h_blk = h_ref[...]
    acc_ref[...] += jnp.dot(a_ref[...], h_blk,
                            preferred_element_type=jnp.float32)

    @pl.when(kk == pl.num_programs(1) - 1)
    def _():
        t = acc_ref[...].astype(jnp.bfloat16)
        out = jnp.dot(t, w_ref[...], preferred_element_type=jnp.float32)
        out = out + b_ref[...]
        if apply_relu:
            out = jnp.maximum(out, 0.0)
        o_ref[...] = out.astype(o_ref.dtype)


def _gcn_layer_single_kernel(a_ref, h_ref, w_ref, b_ref, o_ref, *, apply_relu):
    """Single reduction step: no accumulator scratch, fused epilogue."""
    t = jnp.dot(a_ref[...], h_ref[...], preferred_element_type=jnp.float32)
    t = t.astype(jnp.bfloat16)
    out = jnp.dot(t, w_ref[...], preferred_element_type=jnp.float32)
    out = out + b_ref[...]
    if apply_relu:
        out = jnp.maximum(out, 0.0)
    o_ref[...] = out.astype(o_ref.dtype)


def _mean_pool_kernel(p_ref, h_ref, o_ref):
    """out (resident f32 block) accumulates P_tile @ H_tile over the node axis."""
    kk = pl.program_id(0)
    prod = jnp.dot(p_ref[...], h_ref[...], preferred_element_type=jnp.float32)

    @pl.when(kk == 0)
    def _():
        o_ref[...] = prod

    @pl.when(kk > 0)
    def _():
        o_ref[...] += prod


# ---------------------------------------------------------------------------
# pallas_call wrappers
# ---------------------------------------------------------------------------

def gcn_layer(a_hat, h, w, b, *, apply_relu, out_dtype):
    """relu(A_hat @ H @ W + b) in a single fused, tiled Pallas kernel.

    a_hat: [M, K] (bf16-castable), h: [K, Cin], w: [Cin, Cout], b: [1, Cout].
    M, K multiples of 256; Cin, Cout multiples of 128.
    """
    m, k = a_hat.shape
    k2, cin = h.shape
    cin2, cout = w.shape
    assert k == k2 and cin == cin2, (a_hat.shape, h.shape, w.shape)

    # Megacore-aware row tile: guarantee >= 2 row tiles whenever m >= 512.
    tm_max = m // 2 if m >= 512 else m
    tm = _pick_tile(m, (1024, 512, 256, 128, 8), max_tile=tm_max)
    tk = _pick_tile(k, (1024, 512, 256, 128))
    k_steps = k // tk

    a_hat = a_hat.astype(jnp.bfloat16)
    # TODO(synk): on v7x store A_hat as fp8 (e4m3) / on v6e as int8 + dequant
    # scale folded into the epilogue to halve HBM bytes of the dominant stream.
    h = h.astype(jnp.bfloat16)
    w = w.astype(jnp.bfloat16)
    b = b.astype(jnp.float32).reshape(1, cout)

    resident_h = (k * cin * 2) <= _RESIDENT_H_BYTES

    flops = 2 * m * k * cin + 2 * m * cin * cout
    bytes_accessed = (m * k * 2 + k * cin * 2 + cin * cout * 2 + cout * 4
                      + m * cout * jnp.dtype(out_dtype).itemsize)
    cost = pl.CostEstimate(flops=int(flops), transcendentals=0,
                           bytes_accessed=int(bytes_accessed))

    if k_steps == 1:
        kernel = functools.partial(_gcn_layer_single_kernel,
                                   apply_relu=apply_relu)
        grid = (m // tm,)
        in_specs = [
            pl.BlockSpec((tm, k), lambda i: (i, 0)),         # A_hat tile (streamed)
            pl.BlockSpec((k, cin), lambda i: (0, 0)),         # H (resident)
            pl.BlockSpec((cin, cout), lambda i: (0, 0)),      # W (resident)
            pl.BlockSpec((1, cout), lambda i: (0, 0)),        # bias (resident)
        ]
        out_specs = pl.BlockSpec((tm, cout), lambda i: (i, 0))
        scratch = ()
        dims = ("parallel",)
    else:
        kernel = functools.partial(_gcn_layer_kernel, apply_relu=apply_relu,
                                   resident_h=resident_h, tk=tk)
        grid = (m // tm, k_steps)
        if resident_h:
            h_spec = pl.BlockSpec((k, cin), lambda i, kk: (0, 0))
        else:
            h_spec = pl.BlockSpec((tk, cin), lambda i, kk: (kk, 0))
        in_specs = [
            pl.BlockSpec((tm, tk), lambda i, kk: (i, kk)),    # A_hat tile (streamed)
            h_spec,                                           # H panel
            pl.BlockSpec((cin, cout), lambda i, kk: (0, 0)),  # W (resident)
            pl.BlockSpec((1, cout), lambda i, kk: (0, 0)),    # bias (resident)
        ]
        out_specs = pl.BlockSpec((tm, cout), lambda i, kk: (i, 0))
        scratch = (pltpu.VMEM((tm, cin), jnp.float32),)
        dims = ("parallel", "arbitrary")

    return pl.pallas_call(
        kernel,
        out_shape=jax.ShapeDtypeStruct((m, cout), out_dtype),
        grid_spec=pltpu.PrefetchScalarGridSpec(
            num_scalar_prefetch=0,
            grid=grid,
            in_specs=in_specs,
            out_specs=out_specs,
            scratch_shapes=scratch,
        ),
        compiler_params=pltpu.CompilerParams(
            dimension_semantics=dims,
            vmem_limit_bytes=_VMEM_LIMIT_BYTES,
        ),
        cost_estimate=cost,
    )(a_hat, h, w, b)


def global_mean_pool_matmul(p, h):
    """out = P @ H in f32 (P tiny -> output block stays resident, no scratch)."""
    g, k = p.shape
    k2, c = h.shape
    assert k == k2, (p.shape, h.shape)
    tk = _pick_tile(k, (1024, 512, 256, 128))

    p = p.astype(jnp.float32)
    h = h.astype(jnp.float32)

    return pl.pallas_call(
        _mean_pool_kernel,
        out_shape=jax.ShapeDtypeStruct((g, c), jnp.float32),
        grid_spec=pltpu.PrefetchScalarGridSpec(
            num_scalar_prefetch=0,
            grid=(k // tk,),
            in_specs=[pl.BlockSpec((g, tk), lambda kk: (0, kk)),
                      pl.BlockSpec((tk, c), lambda kk: (kk, 0))],
            out_specs=pl.BlockSpec((g, c), lambda kk: (0, 0)),
        ),
        compiler_params=pltpu.CompilerParams(
            dimension_semantics=("arbitrary",),
            vmem_limit_bytes=_VMEM_LIMIT_BYTES,
        ),
        cost_estimate=pl.CostEstimate(
            flops=2 * g * k * c, transcendentals=0,
            bytes_accessed=int(4 * (g * k + k * c + g * c)),
        ),
    )(p, h)


# ---------------------------------------------------------------------------
# Plain-JAX glue: GCN normalization, pooling matrix, parameter init
# ---------------------------------------------------------------------------

def build_norm_adj(edge_index, num_nodes, edge_weight=None):
    """Dense A_hat = D^{-1/2} (A + I) D^{-1/2}, matching GCNConv(normalize=True)."""
    row = edge_index[0]
    col = edge_index[1]
    if edge_weight is None:
        edge_weight = jnp.ones(row.shape[0], dtype=jnp.float32)
    loop = jnp.arange(num_nodes, dtype=edge_index.dtype)
    row = jnp.concatenate([row, loop])
    col = jnp.concatenate([col, loop])
    w = jnp.concatenate([edge_weight.astype(jnp.float32),
                         jnp.ones(num_nodes, jnp.float32)])
    deg = jnp.zeros(num_nodes, jnp.float32).at[col].add(w)
    deg_inv_sqrt = jnp.where(deg > 0, 1.0 / jnp.sqrt(deg), 0.0)
    norm = deg_inv_sqrt[row] * w * deg_inv_sqrt[col]
    # message flows source(row) -> target(col): out = A_hat @ x with A_hat[col, row]
    a = jnp.zeros((num_nodes, num_nodes), jnp.float32).at[col, row].add(norm)
    return a


def build_pool_matrix(batch, num_graphs):
    onehot = (batch[None, :] == jnp.arange(num_graphs)[:, None]).astype(jnp.float32)
    counts = onehot.sum(axis=1, keepdims=True)
    return onehot / jnp.maximum(counts, 1.0)


def init_gcn_params(key, in_channels, hidden_channels_list, out_channels):
    dims = [in_channels] + list(hidden_channels_list) + [out_channels]
    params = []
    for i in range(len(dims) - 1):
        key, sub = jax.random.split(key)
        fan_in, fan_out = dims[i], dims[i + 1]
        limit = (6.0 / (fan_in + fan_out)) ** 0.5  # glorot uniform (as in GCNConv)
        w = jax.random.uniform(sub, (fan_in, fan_out), jnp.float32, -limit, limit)
        b = jnp.zeros((1, fan_out), jnp.float32)   # GCNConv bias init: zeros
        params.append((w, b))
    return params


# ---------------------------------------------------------------------------
# Forward pass
# ---------------------------------------------------------------------------

def gcn_forward(x, edge_index, batch, params, num_graphs, edge_weight=None):
    n, c_in = x.shape
    out_channels = params[-1][0].shape[1]

    # Pad node dim to a 256-multiple (MXU/lane friendly tiles on all generations).
    n_pad = max(_round_up(n, 256), 256)
    a_hat = _pad2(build_norm_adj(edge_index, n, edge_weight), n_pad, n_pad)

    # Pad channel dims to 128 so every kernel output is lane-dense.
    h = _pad2(x.astype(jnp.float32), n_pad, _round_up(c_in, LANE))

    num_layers = len(params)
    for li, (w, b) in enumerate(params):
        cin, cout = w.shape
        cin_p = _round_up(cin, LANE)
        cout_p = _round_up(cout, LANE)
        w_p = _pad2(w.astype(jnp.float32), cin_p, cout_p)
        b_p = jnp.pad(b.reshape(1, -1).astype(jnp.float32),
                      ((0, 0), (0, cout_p - cout)))

        last = (li == num_layers - 1)
        # F.dropout(p=0.5, training=False) is the identity.
        # Last layer's H kept in f32 so the pooling matmul is pure f32.
        h = gcn_layer(a_hat, h, w_p, b_p, apply_relu=not last,
                      out_dtype=jnp.float32 if last else jnp.bfloat16)
        # (Padded node rows now hold relu(bias) garbage, but A_hat and the pool
        #  matrix have zero columns for padded nodes, so it never leaks.)

    # Global mean pool as a [G_pad, N_pad] @ [N_pad, C_pad] f32 matmul.
    g_pad = max(_round_up(num_graphs, 8), 8)
    p = _pad2(build_pool_matrix(batch, num_graphs), g_pad, n_pad)
    pooled = global_mean_pool_matmul(p, h)

    out = pooled[:num_graphs, :out_channels]
    # torch's .squeeze(-1): drop last dim only if it has size 1
    if out.shape[-1] == 1:
        out = jnp.squeeze(out, axis=-1)
    return out


# Pure-JAX reference (f32 end to end) for a correctness check.
def gcn_reference(x, edge_index, batch, params, num_graphs):
    a_hat = build_norm_adj(edge_index, x.shape[0])
    h = x.astype(jnp.float32)
    for li, (w, b) in enumerate(params):
        h = a_hat @ (h @ w) + b
        if li < len(params) - 1:
            h = jnp.maximum(h, 0.0)
    out = build_pool_matrix(batch, num_graphs) @ h
    if out.shape[-1] == 1:
        out = jnp.squeeze(out, axis=-1)
    return out


# ---------------------------------------------------------------------------
# Demo
# ---------------------------------------------------------------------------

if __name__ == "__main__":
    key = jax.random.PRNGKey(0)
    k_x, k_src, k_dst, k_param = jax.random.split(key, 4)

    num_nodes = 16
    num_edges = 40
    num_graphs = 2
    in_channels = 4
    hidden_channels_list = [32, 32]
    out_channels = 3

    x = jax.random.normal(k_x, (num_nodes, in_channels), jnp.float32)
    src = jax.random.randint(k_src, (num_edges,), 0, num_nodes, dtype=jnp.int32)
    dst = jax.random.randint(k_dst, (num_edges,), 0, num_nodes, dtype=jnp.int32)
    edge_index = jnp.stack([src, dst], axis=0)
    batch = jnp.concatenate([
        jnp.zeros(num_nodes // 2, jnp.int32),
        jnp.ones(num_nodes - num_nodes // 2, jnp.int32),
    ])

    params = init_gcn_params(k_param, in_channels, hidden_channels_list, out_channels)

    fwd = jax.jit(gcn_forward, static_argnames=("num_graphs",))
    out = fwd(x, edge_index, batch, params, num_graphs=num_graphs)
    jax.block_until_ready(out)
    assert out.shape == (num_graphs, out_channels)

    ref = gcn_reference(x, edge_index, batch, params, num_graphs)
    max_err = float(jnp.max(jnp.abs(out - ref)))
    assert max_err < 5e-2, f"max abs error vs f32 reference: {max_err}"

    print("KERNEL_OK")
</pallas_src>

<mosaic_0001>
module attributes {stable_mosaic.version = 11 : i64} {
  func.func @_gcn_layer_single_kernel(%arg0: i32, %arg1: memref<256x256xbf16, #tpu.memory_space<vmem>>, %arg2: memref<256x128xbf16, #tpu.memory_space<vmem>>, %arg3: memref<128x128xbf16, #tpu.memory_space<vmem>>, %arg4: memref<1x128xf32, #tpu.memory_space<vmem>>, %arg5: memref<256x128xbf16, #tpu.memory_space<vmem>>) attributes {dimension_semantics = [#tpu.dimension_semantics<parallel>], iteration_bounds = array<i64: 1>, scalar_prefetch = 0 : i64, scratch_operands = 0 : i64, tpu.core_type = #tpu.core_type<tc>, window_params = [{transform_indices = @transform_0, window_bounds = array<i64: 256, 256>}, {pipeline_mode = #tpu.pipeline_mode<synchronous>, transform_indices = @transform_1, window_bounds = array<i64: 256, 128>}, {pipeline_mode = #tpu.pipeline_mode<synchronous>, transform_indices = @transform_2, window_bounds = array<i64: 128, 128>}, {pipeline_mode = #tpu.pipeline_mode<synchronous>, transform_indices = @transform_3, window_bounds = array<i64: 1, 128>}, {transform_indices = @transform_4, window_bounds = array<i64: 256, 128>}]} {
    %c0 = arith.constant 0 : index
    %c0_0 = arith.constant 0 : index
    %0 = vector.load %arg1[%c0, %c0_0] : memref<256x256xbf16, #tpu.memory_space<vmem>>, vector<256x256xbf16>
    %c0_1 = arith.constant 0 : index
    %c0_2 = arith.constant 0 : index
    %1 = vector.load %arg2[%c0_1, %c0_2] : memref<256x128xbf16, #tpu.memory_space<vmem>>, vector<256x128xbf16>
    %cst = arith.constant dense<0.000000e+00> : vector<256x128xf32>
    %2 = tpu.matmul %0, %1, %cst {dimension_numbers = #tpu.dot_dimension_numbers<[1], [0], [0], [1], [0, 0, 1, 1], [], []>} : vector<256x256xbf16>, vector<256x128xbf16>, vector<256x128xf32> -> vector<256x128xf32>
    %3 = arith.truncf %2 : vector<256x128xf32> to vector<256x128xbf16>
    %c0_3 = arith.constant 0 : index
    %c0_4 = arith.constant 0 : index
    %4 = vector.load %arg3[%c0_3, %c0_4] : memref<128x128xbf16, #tpu.memory_space<vmem>>, vector<128x128xbf16>
    %cst_5 = arith.constant dense<0.000000e+00> : vector<256x128xf32>
    %5 = tpu.matmul %3, %4, %cst_5 {dimension_numbers = #tpu.dot_dimension_numbers<[1], [0], [0], [1], [0, 0, 1, 1], [], []>} : vector<256x128xbf16>, vector<128x128xbf16>, vector<256x128xf32> -> vector<256x128xf32>
    %c0_6 = arith.constant 0 : index
    %c0_7 = arith.constant 0 : index
    %6 = vector.load %arg4[%c0_6, %c0_7] : memref<1x128xf32, #tpu.memory_space<vmem>>, vector<1x128xf32>
    %7 = vector.broadcast %6 : vector<1x128xf32> to vector<256x128xf32>
    %8 = arith.addf %5, %7 : vector<256x128xf32>
    %cst_8 = arith.constant 0.000000e+00 : f32
    %9 = vector.broadcast %cst_8 : f32 to vector<256x128xf32>
    %10 = arith.maximumf %8, %9 : vector<256x128xf32>
    %11 = arith.truncf %10 : vector<256x128xf32> to vector<256x128xbf16>
    %c0_9 = arith.constant 0 : index
    %c0_10 = arith.constant 0 : index
    %12 = vector.load %arg5[%c0_9, %c0_10] : memref<256x128xbf16, #tpu.memory_space<vmem>>, vector<256x128xbf16>
    tpu.vector_store %arg5[%c0_9, %c0_10], %11 {strides = array<i32>} : memref<256x128xbf16, #tpu.memory_space<vmem>>, vector<256x128xbf16>,
    return
  }
  func.func @transform_0(%arg0: i32) -> (i32, i32) {
    %c0_i32 = arith.constant 0 : i32
    %c0_i32_0 = arith.constant 0 : i32
    return %arg0, %c0_i32 : i32, i32
  }
  func.func @transform_1(%arg0: i32) -> (i32, i32) {
    %c0_i32 = arith.constant 0 : i32
    %c0_i32_0 = arith.constant 0 : i32
    %c0_i32_1 = arith.constant 0 : i32
    return %c0_i32, %c0_i32_0 : i32, i32
  }
  func.func @transform_2(%arg0: i32) -> (i32, i32) {
    %c0_i32 = arith.constant 0 : i32
    %c0_i32_0 = arith.constant 0 : i32
    %c0_i32_1 = arith.constant 0 : i32
    return %c0_i32, %c0_i32_0 : i32, i32
  }
  func.func @transform_3(%arg0: i32) -> (i32, i32) {
    %c0_i32 = arith.constant 0 : i32
    %c0_i32_0 = arith.constant 0 : i32
    %c0_i32_1 = arith.constant 0 : i32
    return %c0_i32, %c0_i32_0 : i32, i32
  }
  func.func @transform_4(%arg0: i32) -> (i32, i32) {
    %c0_i32 = arith.constant 0 : i32
    %c0_i32_0 = arith.constant 0 : i32
    return %arg0, %c0_i32 : i32, i32
  }
}

module attributes {stable_mosaic.version = 11 : i64} {
  func.func @_gcn_layer_single_kernel(%arg0: i32, %arg1: memref<256x256xbf16, #tpu.memory_space<vmem>>, %arg2: memref<256x128xbf16, #tpu.memory_space<vmem>>, %arg3: memref<128x128xbf16, #tpu.memory_space<vmem>>, %arg4: memref<1x128xf32, #tpu.memory_space<vmem>>, %arg5: memref<256x128xf32, #tpu.memory_space<vmem>>) attributes {dimension_semantics = [#tpu.dimension_semantics<parallel>], iteration_bounds = array<i64: 1>, scalar_prefetch = 0 : i64, scratch_operands = 0 : i64, tpu.core_type = #tpu.core_type<tc>, window_params = [{transform_indices = @transform_0, window_bounds = array<i64: 256, 256>}, {pipeline_mode = #tpu.pipeline_mode<synchronous>, transform_indices = @transform_1, window_bounds = array<i64: 256, 128>}, {pipeline_mode = #tpu.pipeline_mode<synchronous>, transform_indices = @transform_2, window_bounds = array<i64: 128, 128>}, {pipeline_mode = #tpu.pipeline_mode<synchronous>, transform_indices = @transform_3, window_bounds = array<i64: 1, 128>}, {transform_indices = @transform_4, window_bounds = array<i64: 256, 128>}]} {
    %c0 = arith.constant 0 : index
    %c0_0 = arith.constant 0 : index
    %0 = vector.load %arg1[%c0, %c0_0] : memref<256x256xbf16, #tpu.memory_space<vmem>>, vector<256x256xbf16>
    %c0_1 = arith.constant 0 : index
    %c0_2 = arith.constant 0 : index
    %1 = vector.load %arg2[%c0_1, %c0_2] : memref<256x128xbf16, #tpu.memory_space<vmem>>, vector<256x128xbf16>
    %cst = arith.constant dense<0.000000e+00> : vector<256x128xf32>
    %2 = tpu.matmul %0, %1, %cst {dimension_numbers = #tpu.dot_dimension_numbers<[1], [0], [0], [1], [0, 0, 1, 1], [], []>} : vector<256x256xbf16>, vector<256x128xbf16>, vector<256x128xf32> -> vector<256x128xf32>
    %3 = arith.truncf %2 : vector<256x128xf32> to vector<256x128xbf16>
    %c0_3 = arith.constant 0 : index
    %c0_4 = arith.constant 0 : index
    %4 = vector.load %arg3[%c0_3, %c0_4] : memref<128x128xbf16, #tpu.memory_space<vmem>>, vector<128x128xbf16>
    %cst_5 = arith.constant dense<0.000000e+00> : vector<256x128xf32>
    %5 = tpu.matmul %3, %4, %cst_5 {dimension_numbers = #tpu.dot_dimension_numbers<[1], [0], [0], [1], [0, 0, 1, 1], [], []>} : vector<256x128xbf16>, vector<128x128xbf16>, vector<256x128xf32> -> vector<256x128xf32>
    %c0_6 = arith.constant 0 : index
    %c0_7 = arith.constant 0 : index
    %6 = vector.load %arg4[%c0_6, %c0_7] : memref<1x128xf32, #tpu.memory_space<vmem>>, vector<1x128xf32>
    %7 = vector.broadcast %6 : vector<1x128xf32> to vector<256x128xf32>
    %8 = arith.addf %5, %7 : vector<256x128xf32>
    %c0_8 = arith.constant 0 : index
    %c0_9 = arith.constant 0 : index
    %9 = vector.load %arg5[%c0_8, %c0_9] : memref<256x128xf32, #tpu.memory_space<vmem>>, vector<256x128xf32>
    tpu.vector_store %arg5[%c0_8, %c0_9], %8 {strides = array<i32>} : memref<256x128xf32, #tpu.memory_space<vmem>>, vector<256x128xf32>,
    return
  }
  func.func @transform_0(%arg0: i32) -> (i32, i32) {
    %c0_i32 = arith.constant 0 : i32
    %c0_i32_0 = arith.constant 0 : i32
    return %arg0, %c0_i32 : i32, i32
  }
  func.func @transform_1(%arg0: i32) -> (i32, i32) {
    %c0_i32 = arith.constant 0 : i32
    %c0_i32_0 = arith.constant 0 : i32
    %c0_i32_1 = arith.constant 0 : i32
    return %c0_i32, %c0_i32_0 : i32, i32
  }
  func.func @transform_2(%arg0: i32) -> (i32, i32) {
    %c0_i32 = arith.constant 0 : i32
    %c0_i32_0 = arith.constant 0 : i32
    %c0_i32_1 = arith.constant 0 : i32
    return %c0_i32, %c0_i32_0 : i32, i32
  }
  func.func @transform_3(%arg0: i32) -> (i32, i32) {
    %c0_i32 = arith.constant 0 : i32
    %c0_i32_0 = arith.constant 0 : i32
    %c0_i32_1 = arith.constant 0 : i32
    return %c0_i32, %c0_i32_0 : i32, i32
  }
  func.func @transform_4(%arg0: i32) -> (i32, i32) {
    %c0_i32 = arith.constant 0 : i32
    %c0_i32_0 = arith.constant 0 : i32
    return %arg0, %c0_i32 : i32, i32
  }
}

module attributes {stable_mosaic.version = 11 : i64} {
  func.func @_mean_pool_kernel(%arg0: i32, %arg1: memref<8x256xf32, #tpu.memory_space<vmem>>, %arg2: memref<256x128xf32, #tpu.memory_space<vmem>>, %arg3: memref<8x128xf32, #tpu.memory_space<vmem>>) attributes {dimension_semantics = [#tpu.dimension_semantics<arbitrary>], iteration_bounds = array<i64: 1>, scalar_prefetch = 0 : i64, scratch_operands = 0 : i64, tpu.core_type = #tpu.core_type<tc>, window_params = [{transform_indices = @transform_0, window_bounds = array<i64: 8, 256>}, {transform_indices = @transform_1, window_bounds = array<i64: 256, 128>}, {pipeline_mode = #tpu.pipeline_mode<synchronous>, transform_indices = @transform_2, window_bounds = array<i64: 8, 128>}]} {
    %c0 = arith.constant 0 : index
    %c0_0 = arith.constant 0 : index
    %0 = vector.load %arg1[%c0, %c0_0] : memref<8x256xf32, #tpu.memory_space<vmem>>, vector<8x256xf32>
    %c0_1 = arith.constant 0 : index
    %c0_2 = arith.constant 0 : index
    %1 = vector.load %arg2[%c0_1, %c0_2] : memref<256x128xf32, #tpu.memory_space<vmem>>, vector<256x128xf32>
    %cst = arith.constant dense<0.000000e+00> : vector<8x128xf32>
    %2 = tpu.matmul %0, %1, %cst {dimension_numbers = #tpu.dot_dimension_numbers<[1], [0], [0], [1], [0, 0, 1, 1], [], []>} : vector<8x256xf32>, vector<256x128xf32>, vector<8x128xf32> -> vector<8x128xf32>
    %c0_i32 = arith.constant 0 : i32
    %3 = arith.cmpi eq, %arg0, %c0_i32 : i32
    %4 = arith.extui %3 : i1 to i32
    %c0_i32_3 = arith.constant 0 : i32
    %5 = arith.cmpi ne, %4, %c0_i32_3 : i32
    scf.if %5 {
      %c0_6 = arith.constant 0 : index
      %c0_7 = arith.constant 0 : index
      %9 = vector.load %arg3[%c0_6, %c0_7] : memref<8x128xf32, #tpu.memory_space<vmem>>, vector<8x128xf32>
      tpu.vector_store %arg3[%c0_6, %c0_7], %2 {strides = array<i32>} : memref<8x128xf32, #tpu.memory_space<vmem>>, vector<8x128xf32>,
    } else {
    }
    %c0_i32_4 = arith.constant 0 : i32
    %6 = arith.cmpi sgt, %arg0, %c0_i32_4 : i32
    %7 = arith.extui %6 : i1 to i32
    %c0_i32_5 = arith.constant 0 : i32
    %8 = arith.cmpi ne, %7, %c0_i32_5 : i32
    scf.if %8 {
      %c0_6 = arith.constant 0 : index
      %c0_7 = arith.constant 0 : index
      %9 = vector.load %arg3[%c0_6, %c0_7] : memref<8x128xf32, #tpu.memory_space<vmem>>, vector<8x128xf32>
      %10 = arith.addf %9, %2 : vector<8x128xf32>
      %c0_8 = arith.constant 0 : index
      %c0_9 = arith.constant 0 : index
      %11 = vector.load %arg3[%c0_8, %c0_9] : memref<8x128xf32, #tpu.memory_space<vmem>>, vector<8x128xf32>
      tpu.vector_store %arg3[%c0_8, %c0_9], %10 {strides = array<i32>} : memref<8x128xf32, #tpu.memory_space<vmem>>, vector<8x128xf32>,
    } else {
    }
    return
  }
  func.func @transform_0(%arg0: i32) -> (i32, i32) {
    %c0_i32 = arith.constant 0 : i32
    %c0_i32_0 = arith.constant 0 : i32
    return %c0_i32, %arg0 : i32, i32
  }
  func.func @transform_1(%arg0: i32) -> (i32, i32) {
    %c0_i32 = arith.constant 0 : i32
    %c0_i32_0 = arith.constant 0 : i32
    return %arg0, %c0_i32 : i32, i32
  }
  func.func @transform_2(%arg0: i32) -> (i32, i32) {
    %c0_i32 = arith.constant 0 : i32
    %c0_i32_0 = arith.constant 0 : i32
    %c0_i32_1 = arith.constant 0 : i32
    return %c0_i32, %c0_i32_0 : i32, i32
  }
}

</mosaic_0001>

<bundles_post_ra>
// kernel: mul.1
= control target key start
LH: loop header
LB: loop body
LE: loop exit
PB: predicated region body
PF: predicated region fallthrough
CT: control target
= control target key end

     0   :  { %s34_s0 = inlined_call_operand.vmem [shape: f32[56], index: 0, kind: input, shape index: {}]   ;;  %s35_s1 = inlined_call_operand.vmem [shape: f32[56], index: 1, kind: input, shape index: {}]   ;;  %s36_s2 = inlined_call_operand.vmem [shape: f32[56], index: 2, kind: output, shape index: {}]  }
   0x1   :  { %v3_v0 = vld [vmem:[%s34_s0] sm:$0x1] }
   0x2   :  { %v4_v1 = vld [vmem:[%s35_s1] sm:$0x1] }
   0x3   :  { %v7_v2 = vmul.f32 %v4_v1, %v3_v0 }
   0x5   :  { %9 = vst [vmem:[%s36_s2] sm:$0x1] %v7_v2 }

// kernel: gcn_forward.4
= control target key start
LH: loop header
LB: loop body
LE: loop exit
PB: predicated region body
PF: predicated region fallthrough
CT: control target
= control target key end

     0   :  { %s1574_s1 = inlined_call_operand.vmem [shape: bf16[256,128], index: 1, kind: input, shape index: {}]   ;;  %s1575_s0 = inlined_call_operand.vmem [shape: bf16[256,256], index: 0, kind: input, shape index: {}]   ;;  %s1576_s2 = inlined_call_operand.vmem [shape: bf16[128,128], index: 2, kind: input, shape index: {}]   ;;  %s1577_s3 = inlined_call_operand.vmem [shape: f32[1,128], index: 3, kind: input, shape index: {}]   ;;  %s1578_s4 = inlined_call_operand.vmem [shape: bf16[256,128], index: 4, kind: output, shape index: {}]  }
   0x1   :  { %v1051_v0 = vld [vmem:[%s1574_s1 + $0x38] sm:$0xff]  ;;  %v1050_v2 = vld [vmem:[%s1574_s1 + $0x30] sm:$0xff]  ;;  %v1049_v4 = vld [vmem:[%s1574_s1 + $0x28] sm:$0xff] }
   0x2   :  { %v1059_v1 = vld [vmem:[%s1574_s1 + $0x78] sm:$0xff]  ;;  %337 = vmatpush.bf16.msra.mxu0 %v1051_v0  ;;  %1163 = vmatpush.bf16.msra.mxu3 %v1051_v0  ;;  %v1058_v3 = vld [vmem:[%s1574_s1 + $0x70] sm:$0xff]  ;;  %v1057_v5 = vld [vmem:[%s1574_s1 + $0x68] sm:$0xff] }
   0x3   :  { %426 = vmatpush.bf16.msra.mxu1 %v1059_v1  ;;  %v1048_v6 = vld [vmem:[%s1574_s1 + $0x20] sm:$0xff]  ;;  %v1047_v8 = vld [vmem:[%s1574_s1 + $0x18] sm:$0xff]  ;;  %v1046_v10 = vld [vmem:[%s1574_s1 + $0x10] sm:$0xff] }
   0x4   :  { %v1056_v7 = vld [vmem:[%s1574_s1 + $0x60] sm:$0xff]  ;;  %v1055_v9 = vld [vmem:[%s1574_s1 + $0x58] sm:$0xff]  ;;  %v1054_v11 = vld [vmem:[%s1574_s1 + $0x50] sm:$0xff] }
   0x5   :  { %v1045_v12 = vld [vmem:[%s1574_s1 + $0x8] sm:$0xff]  ;;  %v1044_v14 = vld [vmem:[%s1574_s1] sm:$0xff]  ;;  %v798_v25 = vld [vmem:[%s1575_s0 + $0x10] sm:$0xf] }
   0x6   :  { %338 = vmatpush.bf16.msra.mxu0 %v1050_v2  ;;  %1164 = vmatpush.bf16.msra.mxu3 %v1050_v2  ;;  %v1053_v13 = vld [vmem:[%s1574_s1 + $0x48] sm:$0xff]  ;;  %v790_v15 = vld [vmem:[%s1575_s0] sm:$0xf]  ;;  %v1012_v20 = vld [vmem:[%s1575_s0 + $0x4] sm:$0xf] }
   0x7   :  { %427 = vmatpush.bf16.msra.mxu1 %v1058_v3  ;;  %v1013_v16 = vld [vmem:[%s1575_s0 + $0x4] sm:$0xf0]  ;;  %v886_v17 = vld [vmem:[%s1575_s0 + $0xc0] sm:$0xf]  ;;  %v792_v21 = vld [vmem:[%s1575_s0 + $0x8] sm:$0xf0] }
   0x8   :  { %v1037_v18 = vld [vmem:[%s1575_s0 + $0xc4] sm:$0xf0]  ;;  %v1052_v19 = vld [vmem:[%s1574_s1 + $0x40] sm:$0xff]  ;;  %v791_v22 = vor.u32 %v1013_v16, %v790_v15  ;;  %v795_v24 = vor.u32 %v1012_v20, %v792_v21  ;;  %v1015_v26 = vld [vmem:[%s1575_s0 + $0x14] sm:$0xf0] }
   0x9   :  { %v887_v23 = vor.u32 %v1037_v18, %v886_v17  ;;  %v894_v27 = vld [vmem:[%s1575_s0 + $0xd0] sm:$0xf]  ;;  %v1039_v28 = vld [vmem:[%s1575_s0 + $0xd4] sm:$0xf0]  ;;  %v1014_v29 = vld [vmem:[%s1575_s0 + $0x14] sm:$0xf]  ;;  %v799_v31 = vor.u32 %v1015_v26, %v798_v25 }
   0xa   :  { %339 = vmatpush.bf16.msra.mxu0 %v1049_v4  ;;  %1165 = vmatpush.bf16.msra.mxu3 %v1049_v4  ;;  %v800_v30 = vld [vmem:[%s1575_s0 + $0x18] sm:$0xf0]  ;;  %v895_v32 = vor.u32 %v1039_v28, %v894_v27  ;;  %v806_v34 = vld [vmem:[%s1575_s0 + $0x20] sm:$0xf]  ;;  %v1017_v35 = vld [vmem:[%s1575_s0 + $0x24] sm:$0xf0] }
   0xb   :  { %428 = vmatpush.bf16.msra.mxu1 %v1057_v5  ;;  %v803_v33 = vor.u32 %v1014_v29, %v800_v30  ;;  %v902_v36 = vld [vmem:[%s1575_s0 + $0xe0] sm:$0xf]  ;;  %v1041_v37 = vld [vmem:[%s1575_s0 + $0xe4] sm:$0xf0]  ;;  %v1016_v38 = vld [vmem:[%s1575_s0 + $0x24] sm:$0xf]  ;;  %v807_v40 = vor.u32 %v1017_v35, %v806_v34 }
   0xc   :  { %v808_v39 = vld [vmem:[%s1575_s0 + $0x28] sm:$0xf0]  ;;  %v903_v41 = vor.u32 %v1041_v37, %v902_v36  ;;  %v814_v43 = vld [vmem:[%s1575_s0 + $0x30] sm:$0xf]  ;;  %v1019_v44 = vld [vmem:[%s1575_s0 + $0x34] sm:$0xf0] }
   0xd   :  { %v811_v42 = vor.u32 %v1016_v38, %v808_v39  ;;  %v910_v45 = vld [vmem:[%s1575_s0 + $0xf0] sm:$0xf]  ;;  %v1043_v46 = vld [vmem:[%s1575_s0 + $0xf4] sm:$0xf0]  ;;  %v1018_v47 = vld [vmem:[%s1575_s0 + $0x34] sm:$0xf]  ;;  %v815_v49 = vor.u32 %v1019_v44, %v814_v43 }
   0xe   :  { %340 = vmatpush.bf16.msra.mxu0 %v1048_v6  ;;  %1166 = vmatpush.bf16.msra.mxu3 %v1048_v6  ;;  %v816_v48 = vld [vmem:[%s1575_s0 + $0x38] sm:$0xf0]  ;;  %v911_v50 = vor.u32 %v1043_v46, %v910_v45  ;;  %v822_v52 = vld [vmem:[%s1575_s0 + $0x40] sm:$0xf]  ;;  %v1021_v53 = vld [vmem:[%s1575_s0 + $0x44] sm:$0xf0] }
   0xf   :  { %429 = vmatpush.bf16.msra.mxu1 %v1056_v7  ;;  %v819_v51 = vor.u32 %v1018_v47, %v816_v48  ;;  %v1036_v54 = vld [vmem:[%s1575_s0 + $0xc4] sm:$0xf]  ;;  %v888_v55 = vld [vmem:[%s1575_s0 + $0xc8] sm:$0xf0]  ;;  %v823_v58 = vor.u32 %v1021_v53, %v822_v52  ;;  %v1067_v61 = vld [vmem:[%s1576_s2 + $0x38] sm:$0xff] }
  0x10   :  { %v1020_v56 = vld [vmem:[%s1575_s0 + $0x44] sm:$0xf]  ;;  %v824_v57 = vld [vmem:[%s1575_s0 + $0x48] sm:$0xf0]  ;;  %v891_v59 = vor.u32 %v1036_v54, %v888_v55  ;;  %599 = vmatpush.bf16.msra.mxu2 %v1067_v61  ;;  %v1066_v62 = vld [vmem:[%s1576_s2 + $0x30] sm:$0xff] }
  0x11   :  { %v827_v60 = vor.u32 %v1020_v56, %v824_v57  ;;  %v830_v63 = vld [vmem:[%s1575_s0 + $0x50] sm:$0xf]  ;;  %v1023_v0 = vld [vmem:[%s1575_s0 + $0x54] sm:$0xf0]  ;;  %v896_v2 = vld [vmem:[%s1575_s0 + $0xd8] sm:$0xf0] }
  0x12   :  { %341 = vmatpush.bf16.msra.mxu0 %v1047_v8  ;;  %1167 = vmatpush.bf16.msra.mxu3 %v1047_v8  ;;  %v832_v4 = vld [vmem:[%s1575_s0 + $0x58] sm:$0xf0]  ;;  %v1065_v8 = vld [vmem:[%s1576_s2 + $0x28] sm:$0xff]  ;;  %v1024_v15 = vld [vmem:[%s1575_s0 + $0x64] sm:$0xf] }
  0x13   :  { %430 = vmatpush.bf16.msra.mxu1 %v1055_v9  ;;  %v840_v16 = vld [vmem:[%s1575_s0 + $0x68] sm:$0xf0]  ;;  %v1062_v20 = vld [vmem:[%s1576_s2 + $0x10] sm:$0xff]  ;;  %v912_v26 = vld [vmem:[%s1575_s0 + $0xf8] sm:$0xf0] }
  0x14   :  { %600 = vmatpush.bf16.msra.mxu2 %v1066_v62  ;;  %v1061_v21 = vld [vmem:[%s1576_s2 + $0x8] sm:$0xff]  ;;  %v1042_v25 = vld [vmem:[%s1575_s0 + $0xf4] sm:$0xf]  ;;  %v848_v28 = vld [vmem:[%s1575_s0 + $0x78] sm:$0xf0] }
  0x15   :  { %v1026_v27 = vld [vmem:[%s1575_s0 + $0x74] sm:$0xf]  ;;  %v915_v30 = vor.u32 %v1042_v25, %v912_v26  ;;  %v1028_v34 = vld [vmem:[%s1575_s0 + $0x84] sm:$0xf]  ;;  %v856_v35 = vld [vmem:[%s1575_s0 + $0x88] sm:$0xf0] }
  0x16   :  { %342 = vmatpush.bf16.msra.mxu0 %v1046_v10  ;;  %1168 = vmatpush.bf16.msra.mxu3 %v1046_v10  ;;  %v1063_v10 = vld [vmem:[%s1576_s2 + $0x18] sm:$0xff]  ;;  %v859_v38 = vor.u32 %v1028_v34, %v856_v35  ;;  %v862_v46 = vld [vmem:[%s1575_s0 + $0x90] sm:$0xf]  ;;  %v1030_v48 = vld [vmem:[%s1575_s0 + $0x94] sm:$0xf] }
  0x17   :  { %431 = vmatpush.bf16.msra.mxu1 %v1054_v11  ;;  %v1031_v47 = vld [vmem:[%s1575_s0 + $0x94] sm:$0xf0] }
  0x18   :  { %601 = vmatpush.bf16.msra.mxu2 %v1065_v8 }
  0x1a   :  { %343 = vmatpush.bf16.msra.mxu0 %v1045_v12  ;;  %1169 = vmatpush.bf16.msra.mxu3 %v1045_v12  ;;  %v1025_v12 = vld [vmem:[%s1575_s0 + $0x64] sm:$0xf0] }
  0x1b   :  { %432 = vmatpush.bf16.msra.mxu1 %v1053_v13 }
  0x1e   :  { %344 = vmatpush.bf16.msra.mxu0 %v1044_v14  ;;  %1170 = vmatpush.bf16.msra.mxu3 %v1044_v14  ;;  %v904_v14 = vld [vmem:[%s1575_s0 + $0xe8] sm:$0xf0] }
  0x1f   :  { %433 = vmatpush.bf16.msra.mxu1 %v1052_v19 }
  0x21   :  { %345 = vmatmul.bf16.vlgmr.msra.gmra.mxu0 %v791_v22  ;;  %405 = vmatmul.bf16.vlgmr.msra.gmra.mxu3 %v887_v23  ;;  %v1060_v22 = vld [vmem:[%s1576_s2] sm:$0xff]  ;;  %v846_v23 = vld [vmem:[%s1575_s0 + $0x70] sm:$0xf] }
  0x22   :  { %1171 = vmatpush.bf16.msrb.mxu3 %v1059_v1  ;;  %434 = vmatmul.bf16.vlgmr.msra.gmra.mxu1 %v795_v24  ;;  %v1038_v1 = vld [vmem:[%s1575_s0 + $0xd4] sm:$0xf]  ;;  %v1027_v24 = vld [vmem:[%s1575_s0 + $0x74] sm:$0xf0] }
  0x23   :  { %v899_v6 = vor.u32 %v1038_v1, %v896_v2  ;;  %v847_v29 = vor.u32 %v1027_v24, %v846_v23 }
  0x26   :  { %1172 = vmatpush.bf16.msrb.mxu3 %v1058_v3  ;;  %v1022_v3 = vld [vmem:[%s1575_s0 + $0x54] sm:$0xf] }
  0x2a   :  { %1173 = vmatpush.bf16.msrb.mxu3 %v1057_v5  ;;  %v831_v5 = vor.u32 %v1023_v0, %v830_v63  ;;  %v1032_v63 = vld [vmem:[%s1575_s0 + $0xa4] sm:$0xf]  ;;  %v872_v0 = vld [vmem:[%s1575_s0 + $0xa8] sm:$0xf0] }
  0x2e   :  { %1174 = vmatpush.bf16.msrb.mxu3 %v1056_v7  ;;  %v835_v7 = vor.u32 %v1022_v3, %v832_v4  ;;  %v875_v4 = vor.u32 %v1032_v63, %v872_v0 }
  0x31   :  { %350 = vmatmul.bf16.gmra.mxu0 %v799_v31  ;;  %410 = vmatmul.bf16.gmra.mxu3 %v895_v32  ;;  %v851_v31 = vor.u32 %v1026_v27, %v848_v28  ;;  %v854_v32 = vld [vmem:[%s1575_s0 + $0x80] sm:$0xf] }
  0x32   :  { %1175 = vmatpush.bf16.msrb.mxu3 %v1055_v9  ;;  %439 = vmatmul.bf16.gmra.mxu1 %v803_v33  ;;  %v1064_v9 = vld [vmem:[%s1576_s2 + $0x20] sm:$0xff]  ;;  %v1029_v33 = vld [vmem:[%s1575_s0 + $0x84] sm:$0xf0] }
  0x33   :  { %602 = vmatpush.bf16.msra.mxu2 %v1064_v9  ;;  %v855_v36 = vor.u32 %v1029_v33, %v854_v32 }
  0x36   :  { %1176 = vmatpush.bf16.msrb.mxu3 %v1054_v11  ;;  %v838_v11 = vld [vmem:[%s1575_s0 + $0x60] sm:$0xf] }
  0x37   :  { %603 = vmatpush.bf16.msra.mxu2 %v1063_v10  ;;  %v839_v17 = vor.u32 %v1025_v12, %v838_v11  ;;  %v878_v12 = vld [vmem:[%s1575_s0 + $0xb0] sm:$0xf] }
  0x3a   :  { %1177 = vmatpush.bf16.msrb.mxu3 %v1053_v13  ;;  %v1040_v13 = vld [vmem:[%s1575_s0 + $0xe4] sm:$0xf] }
  0x3b   :  { %v907_v18 = vor.u32 %v1040_v13, %v904_v14  ;;  %604 = vmatpush.bf16.msra.mxu2 %v1062_v20  ;;  %v1035_v13 = vld [vmem:[%s1575_s0 + $0xb4] sm:$0xf0]  ;;  %v1034_v14 = vld [vmem:[%s1575_s0 + $0xb4] sm:$0xf] }
  0x3e   :  { %1178 = vmatpush.bf16.msrb.mxu3 %v1052_v19  ;;  %v843_v19 = vor.u32 %v1024_v15, %v840_v16  ;;  %v880_v15 = vld [vmem:[%s1575_s0 + $0xb8] sm:$0xf0] }
  0x3f   :  { %605 = vmatpush.bf16.msra.mxu2 %v1061_v21 }
  0x41   :  { %355 = vmatmul.bf16.gmra.mxu0 %v807_v40  ;;  %415 = vmatmul.bf16.gmra.mxu3 %v903_v41 }
  0x42   :  { %444 = vmatmul.bf16.gmra.mxu1 %v811_v42  ;;  %1179 = vmatpush.bf16.msra.mxu3 %v1067_v61  ;;  %v870_v61 = vld [vmem:[%s1575_s0 + $0xa0] sm:$0xf] }
  0x43   :  { %606 = vmatpush.bf16.msra.mxu2 %v1060_v22 }
  0x46   :  { %1180 = vmatpush.bf16.msra.mxu3 %v1066_v62  ;;  %v1033_v62 = vld [vmem:[%s1575_s0 + $0xa4] sm:$0xf0] }
  0x47   :  { %v871_v2 = vor.u32 %v1033_v62, %v870_v61 }
  0x4a   :  { %1181 = vmatpush.bf16.msra.mxu3 %v1065_v8 }
  0x4e   :  { %1182 = vmatpush.bf16.msra.mxu3 %v1064_v9 }
  0x51   :  { %360 = vmatmul.bf16.gmra.mxu0 %v815_v49  ;;  %420 = vmatmul.bf16.gmra.mxu3 %v911_v50  ;;  %v864_v49 = vld [vmem:[%s1575_s0 + $0x98] sm:$0xf0] }
  0x52   :  { %449 = vmatmul.bf16.gmra.mxu1 %v819_v51  ;;  %1183 = vmatpush.bf16.msra.mxu3 %v1063_v10  ;;  %v863_v51 = vor.u32 %v1031_v47, %v862_v46  ;;  %v867_v53 = vor.u32 %v1030_v48, %v864_v49 }
  0x56   :  { %1184 = vmatpush.bf16.msra.mxu3 %v1062_v20 }
  0x5a   :  { %1185 = vmatpush.bf16.msra.mxu3 %v1061_v21 }
  0x5e   :  { %1186 = vmatpush.bf16.msra.mxu3 %v1060_v22 }
  0x61   :  { %365 = vmatmul.bf16.gmra.mxu0 %v823_v58  ;;  %494 = vmatmul.bf16.vlgmr.msrb.gmra.mxu3 %v891_v59 }
  0x62   :  { %454 = vmatmul.bf16.gmra.mxu1 %v827_v60 }
  0x71   :  { %370 = vmatmul.bf16.gmra.mxu0 %v831_v5  ;;  %499 = vmatmul.bf16.gmra.mxu3 %v899_v6 }
  0x72   :  { %459 = vmatmul.bf16.gmra.mxu1 %v835_v7 }
  0x81   :  { %375 = vmatmul.bf16.gmra.mxu0 %v839_v17  ;;  %504 = vmatmul.bf16.gmra.mxu3 %v907_v18  ;;  %v879_v17 = vor.u32 %v1035_v13, %v878_v12 }
  0x82   :  { %464 = vmatmul.bf16.gmra.mxu1 %v843_v19  ;;  %v883_v19 = vor.u32 %v1034_v14, %v880_v15 }
  0x91   :  { %380 = vmatmul.bf16.gmra.mxu0 %v847_v29  ;;  %509 = vmatmul.bf16.gmra.mxu3 %v915_v30 }
  0x92   :  { %469 = vmatmul.bf16.gmra.mxu1 %v851_v31 }
  0x9e   :  { %v346_v37 = vpop.f32.mrf.mxu0 }
  0x9f   :  { %v435_v39 = vpop.f32.mrf.mxu1 }
  0xa0   :  { %v436_v43 = vadd.f32 %v435_v39, %v346_v37 }
  0xa1   :  { %385 = vmatmul.bf16.gmra.mxu0 %v855_v36 }
  0xa2   :  { %474 = vmatmul.bf16.gmra.mxu1 %v859_v38 }
  0xa4   :  { %v1441_v40 = vpop.f32.mrf.mxu3 }
  0xa6   :  { %v348_v41 = vpop.f32.mrf.mxu0 }
  0xa7   :  { %v437_v42 = vpop.f32.mrf.mxu1 }
  0xa8   :  { %v438_v44 = vadd.f32 %v437_v42, %v348_v41 }
  0xaa   :  { %v515_v45 = vpack.c.bf16 %v438_v44, %v436_v43 }
  0xac   :  { %607 = vmatmul.bf16.vlgmr.msra.gmra.mxu2 %v515_v45  ;;  %v1455_v50 = vpop.f32.mrf.mxu3 }
  0xae   :  { %v351_v52 = vpop.f32.mrf.mxu0 }
  0xaf   :  { %v440_v54 = vpop.f32.mrf.mxu1 }
  0xb0   :  { %v441_v58 = vadd.f32 %v440_v54, %v351_v52 }
  0xb1   :  { %390 = vmatmul.bf16.gmra.mxu0 %v863_v51 }
  0xb2   :  { %479 = vmatmul.bf16.gmra.mxu1 %v867_v53 }
  0xb4   :  { %v1457_v55 = vpop.f32.mrf.mxu3 }
  0xb6   :  { %v353_v56 = vpop.f32.mrf.mxu0 }
  0xb7   :  { %v442_v57 = vpop.f32.mrf.mxu1 }
  0xb8   :  { %v443_v59 = vadd.f32 %v442_v57, %v353_v56 }
  0xba   :  { %v516_v60 = vpack.c.bf16 %v443_v59, %v441_v58 }
  0xbc   :  { %612 = vmatmul.bf16.gmra.mxu2 %v516_v60  ;;  %v413_v1 = vpop.f32.mrf.mxu3 }
  0xbe   :  { %v356_v3 = vpop.f32.mrf.mxu0 }
  0xbf   :  { %v445_v5 = vpop.f32.mrf.mxu1 }
  0xc0   :  { %v446_v9 = vadd.f32 %v445_v5, %v356_v3 }
  0xc1   :  { %395 = vmatmul.bf16.gmra.mxu0 %v871_v2 }
  0xc2   :  { %484 = vmatmul.bf16.gmra.mxu1 %v875_v4 }
  0xc4   :  { %v1471_v6 = vpop.f32.mrf.mxu3 }
  0xc6   :  { %v358_v7 = vpop.f32.mrf.mxu0 }
  0xc7   :  { %v447_v8 = vpop.f32.mrf.mxu1 }
  0xc8   :  { %v448_v10 = vadd.f32 %v447_v8, %v358_v7 }
  0xca   :  { %v517_v11 = vpack.c.bf16 %v448_v10, %v446_v9 }
  0xcc   :  { %617 = vmatmul.bf16.gmra.mxu2 %v517_v11  ;;  %v418_v16 = vpop.f32.mrf.mxu3 }
  0xce   :  { %v361_v18 = vpop.f32.mrf.mxu0 }
  0xcf   :  { %v450_v20 = vpop.f32.mrf.mxu1 }
  0xd0   :  { %v451_v24 = vadd.f32 %v450_v20, %v361_v18 }
  0xd1   :  { %400 = vmatmul.bf16.gmra.mxu0 %v879_v17 }
  0xd2   :  { %489 = vmatmul.bf16.gmra.mxu1 %v883_v19 }
  0xd4   :  { %v421_v21 = vpop.f32.mrf.mxu3 }
  0xd6   :  { %v363_v22 = vpop.f32.mrf.mxu0 }
  0xd7   :  { %v452_v23 = vpop.f32.mrf.mxu1 }
  0xd8   :  { %v453_v25 = vadd.f32 %v452_v23, %v363_v22  ;;  %v1492_v23 = vld [vmem:[%s1577_s3] ss:$0 sm:$0xff] }
  0xda   :  { %v518_v26 = vpack.c.bf16 %v453_v25, %v451_v24 }
  0xdc   :  { %622 = vmatmul.bf16.gmra.mxu2 %v518_v26  ;;  %v423_v27 = vpop.f32.mrf.mxu3 }
  0xde   :  { %v366_v28 = vpop.f32.mrf.mxu0 }
  0xdf   :  { %v455_v29 = vpop.f32.mrf.mxu1 }
  0xe0   :  { %v456_v33 = vadd.f32 %v455_v29, %v366_v28 }
  0xe4   :  { %v495_v30 = vpop.f32.mrf.mxu3 }
  0xe5   :  { %v496_v37 = vadd.f32 %v495_v30, %v1441_v40 }
  0xe6   :  { %v368_v31 = vpop.f32.mrf.mxu0 }
  0xe7   :  { %v457_v32 = vpop.f32.mrf.mxu1 }
  0xe8   :  { %v458_v34 = vadd.f32 %v457_v32, %v368_v31 }
  0xea   :  { %v519_v35 = vpack.c.bf16 %v458_v34, %v456_v33 }
  0xec   :  { %627 = vmatmul.bf16.gmra.mxu2 %v519_v35  ;;  %v497_v36 = vpop.f32.mrf.mxu3 }
  0xed   :  { %v498_v38 = vadd.f32 %v497_v36, %v1455_v50 }
  0xee   :  { %v371_v39 = vpop.f32.mrf.mxu0 }
  0xef   :  { %v527_v41 = vpack.c.bf16 %v498_v38, %v496_v37  ;;  %v460_v42 = vpop.f32.mrf.mxu1 }
  0xf0   :  { %v461_v46 = vadd.f32 %v460_v42, %v371_v39 }
  0xf1   :  { %667 = vmatmul.bf16.vlgmr.msra.gmra.mxu3 %v527_v41 }
  0xf4   :  { %v500_v43 = vpop.f32.mrf.mxu3 }
  0xf5   :  { %v501_v51 = vadd.f32 %v500_v43, %v1457_v55 }
  0xf6   :  { %v373_v44 = vpop.f32.mrf.mxu0 }
  0xf7   :  { %v462_v45 = vpop.f32.mrf.mxu1 }
  0xf8   :  { %v463_v47 = vadd.f32 %v462_v45, %v373_v44 }
  0xfa   :  { %v520_v48 = vpack.c.bf16 %v463_v47, %v461_v46 }
  0xfc   :  { %632 = vmatmul.bf16.gmra.mxu2 %v520_v48  ;;  %v502_v49 = vpop.f32.mrf.mxu3 }
  0xfd   :  { %v503_v52 = vadd.f32 %v502_v49, %v413_v1 }
  0xfe   :  { %v376_v53 = vpop.f32.mrf.mxu0 }
  0xff   :  { %v465_v54 = vpop.f32.mrf.mxu1  ;;  %v528_v40 = vpack.c.bf16 %v503_v52, %v501_v51 }
 0x100   :  { %v466_v58 = vadd.f32 %v465_v54, %v376_v53 }
 0x101   :  { %672 = vmatmul.bf16.gmra.mxu3 %v528_v40 }
 0x104   :  { %v505_v50 = vpop.f32.mrf.mxu3 }
 0x105   :  { %v506_v62 = vadd.f32 %v505_v50, %v1471_v6 }
 0x106   :  { %v378_v56 = vpop.f32.mrf.mxu0 }
 0x107   :  { %v467_v57 = vpop.f32.mrf.mxu1 }
 0x108   :  { %v468_v59 = vadd.f32 %v467_v57, %v378_v56 }
 0x10a   :  { %v521_v60 = vpack.c.bf16 %v468_v59, %v466_v58 }
 0x10c   :  { %637 = vmatmul.bf16.gmra.mxu2 %v521_v60  ;;  %v507_v61 = vpop.f32.mrf.mxu3 }
 0x10d   :  { %v508_v63 = vadd.f32 %v507_v61, %v418_v16 }
 0x10e   :  { %v381_v0 = vpop.f32.mrf.mxu0 }
 0x10f   :  { %v470_v2 = vpop.f32.mrf.mxu1  ;;  %v529_v3 = vpack.c.bf16 %v508_v63, %v506_v62 }
 0x110   :  { %v471_v5 = vadd.f32 %v470_v2, %v381_v0 }
 0x111   :  { %677 = vmatmul.bf16.gmra.mxu3 %v529_v3 }
 0x114   :  { %v510_v55 = vpop.f32.mrf.mxu3 }
 0x115   :  { %v511_v10 = vadd.f32 %v510_v55, %v421_v21 }
 0x116   :  { %v383_v1 = vpop.f32.mrf.mxu0 }
 0x117   :  { %v472_v4 = vpop.f32.mrf.mxu1 }
 0x118   :  { %v473_v7 = vadd.f32 %v472_v4, %v383_v1 }
 0x11a   :  { %v522_v8 = vpack.c.bf16 %v473_v7, %v471_v5 }
 0x11c   :  { %642 = vmatmul.bf16.gmra.mxu2 %v522_v8  ;;  %v512_v9 = vpop.f32.mrf.mxu3 }
 0x11d   :  { %v513_v11 = vadd.f32 %v512_v9, %v423_v27 }
 0x11e   :  { %v386_v12 = vpop.f32.mrf.mxu0 }
 0x11f   :  { %v475_v13 = vpop.f32.mrf.mxu1  ;;  %v530_v14 = vpack.c.bf16 %v513_v11, %v511_v10 }
 0x120   :  { %v476_v16 = vadd.f32 %v475_v13, %v386_v12 }
 0x121   :  { %682 = vmatmul.bf16.gmra.mxu3 %v530_v14 }
 0x126   :  { %v388_v6 = vpop.f32.mrf.mxu0 }
 0x127   :  { %v477_v15 = vpop.f32.mrf.mxu1 }
 0x128   :  { %v478_v17 = vadd.f32 %v477_v15, %v388_v6 }
 0x12a   :  { %v523_v18 = vpack.c.bf16 %v478_v17, %v476_v16 }
 0x12c   :  { %647 = vmatmul.bf16.gmra.mxu2 %v523_v18 }
 0x12e   :  { %v391_v19 = vpop.f32.mrf.mxu0 }
 0x12f   :  { %v480_v20 = vpop.f32.mrf.mxu1  ;;  %v608_v22 = vpop.f32.mrf.mxu2 }
 0x130   :  { %v609_v21 = vadd.f32 %v1492_v23, %v608_v22  ;;  %v481_v27 = vadd.f32 %v480_v20, %v391_v19 }
 0x132   :  { %v688_v30 = vmax.f32 %v609_v21, 0.0 }
 0x136   :  { %v393_v24 = vpop.f32.mrf.mxu0 }
 0x137   :  { %v482_v25 = vpop.f32.mrf.mxu1  ;;  %v610_v26 = vpop.f32.mrf.mxu2 }
 0x138   :  { %v483_v28 = vadd.f32 %v482_v25, %v393_v24  ;;  %v611_v29 = vadd.f32 %v1492_v23, %v610_v26 }
 0x13a   :  { %v689_v31 = vmax.f32 %v611_v29, 0.0  ;;  %v524_v32 = vpack.c.bf16 %v483_v28, %v481_v27 }
 0x13c   :  { %v1071_v33 = vpack.c.bf16 %v689_v31, %v688_v30  ;;  %652 = vmatmul.bf16.gmra.mxu2 %v524_v32 }
 0x13e   :  { %1072 = vst [vmem:[%s1578_s4] sm:$0xff] %v1071_v33   ;;  %v396_v34 = vpop.f32.mrf.mxu0 }
 0x13f   :  { %v485_v35 = vpop.f32.mrf.mxu1  ;;  %v613_v36 = vpop.f32.mrf.mxu2 }
 0x140   :  { %v614_v37 = vadd.f32 %v1492_v23, %v613_v36  ;;  %v486_v42 = vadd.f32 %v485_v35, %v396_v34 }
 0x142   :  { %v690_v45 = vmax.f32 %v614_v37, 0.0 }
 0x146   :  { %v398_v38 = vpop.f32.mrf.mxu0 }
 0x147   :  { %v487_v39 = vpop.f32.mrf.mxu1  ;;  %v615_v41 = vpop.f32.mrf.mxu2 }
 0x148   :  { %v488_v43 = vadd.f32 %v487_v39, %v398_v38  ;;  %v616_v44 = vadd.f32 %v1492_v23, %v615_v41 }
 0x14a   :  { %v691_v46 = vmax.f32 %v616_v44, 0.0  ;;  %v525_v47 = vpack.c.bf16 %v488_v43, %v486_v42 }
 0x14c   :  { %v1076_v48 = vpack.c.bf16 %v691_v46, %v690_v45  ;;  %657 = vmatmul.bf16.gmra.mxu2 %v525_v47 }
 0x14e   :  { %1148 = vst [vmem:[%s1578_s4 + $0x8] sm:$0xff] %v1076_v48   ;;  %v401_v49 = vpop.f32.mrf.mxu0 }
 0x14f   :  { %v490_v51 = vpop.f32.mrf.mxu1  ;;  %v618_v52 = vpop.f32.mrf.mxu2 }
 0x150   :  { %v619_v53 = vadd.f32 %v1492_v23, %v618_v52  ;;  %v491_v56 = vadd.f32 %v490_v51, %v401_v49 }
 0x152   :  { %v692_v59 = vmax.f32 %v619_v53, 0.0 }
 0x156   :  { %v403_v54 = vpop.f32.mrf.mxu0 }
 0x157   :  { %v492_v40 = vpop.f32.mrf.mxu1  ;;  %v620_v50 = vpop.f32.mrf.mxu2 }
 0x158   :  { %v493_v57 = vadd.f32 %v492_v40, %v403_v54  ;;  %v621_v58 = vadd.f32 %v1492_v23, %v620_v50 }
 0x15a   :  { %v693_v60 = vmax.f32 %v621_v58, 0.0  ;;  %v526_v61 = vpack.c.bf16 %v493_v57, %v491_v56 }
 0x15c   :  { %v1081_v62 = vpack.c.bf16 %v693_v60, %v692_v59  ;;  %662 = vmatmul.bf16.gmra.mxu2 %v526_v61 }
 0x15e   :  { %1149 = vst [vmem:[%s1578_s4 + $0x10] sm:$0xff] %v1081_v62  }
 0x15f   :  { %v623_v63 = vpop.f32.mrf.mxu2 }
 0x160   :  { %v624_v0 = vadd.f32 %v1492_v23, %v623_v63 }
 0x162   :  { %v694_v55 = vmax.f32 %v624_v0, 0.0 }
 0x167   :  { %v625_v2 = vpop.f32.mrf.mxu2 }
 0x168   :  { %v626_v3 = vadd.f32 %v1492_v23, %v625_v2 }
 0x16a   :  { %v695_v1 = vmax.f32 %v626_v3, 0.0 }
 0x16c   :  { %v1086_v4 = vpack.c.bf16 %v695_v1, %v694_v55 }
 0x16e   :  { %1150 = vst [vmem:[%s1578_s4 + $0x18] sm:$0xff] %v1086_v4  }
 0x16f   :  { %v628_v5 = vpop.f32.mrf.mxu2 }
 0x170   :  { %v629_v8 = vadd.f32 %v1492_v23, %v628_v5 }
 0x172   :  { %v696_v11 = vmax.f32 %v629_v8, 0.0 }
 0x174   :  { %v668_v7 = vpop.f32.mrf.mxu3 }
 0x175   :  { %v669_v13 = vadd.f32 %v1492_v23, %v668_v7 }
 0x177   :  { %v630_v9 = vpop.f32.mrf.mxu2  ;;  %v712_v16 = vmax.f32 %v669_v13, 0.0 }
 0x178   :  { %v631_v10 = vadd.f32 %v1492_v23, %v630_v9 }
 0x17a   :  { %v697_v12 = vmax.f32 %v631_v10, 0.0 }
 0x17c   :  { %v1091_v14 = vpack.c.bf16 %v697_v12, %v696_v11  ;;  %v670_v6 = vpop.f32.mrf.mxu3 }
 0x17d   :  { %v671_v15 = vadd.f32 %v1492_v23, %v670_v6 }
 0x17e   :  { %1151 = vst [vmem:[%s1578_s4 + $0x20] sm:$0xff] %v1091_v14  }
 0x17f   :  { %v713_v17 = vmax.f32 %v671_v15, 0.0  ;;  %v633_v18 = vpop.f32.mrf.mxu2 }
 0x180   :  { %v634_v22 = vadd.f32 %v1492_v23, %v633_v18 }
 0x181   :  { %v1131_v19 = vpack.c.bf16 %v713_v17, %v712_v16 }
 0x182   :  { %v698_v25 = vmax.f32 %v634_v22, 0.0 }
 0x183   :  { %1159 = vst [vmem:[%s1578_s4 + $0x60] sm:$0xff] %v1131_v19  }
 0x184   :  { %v673_v20 = vpop.f32.mrf.mxu3 }
 0x185   :  { %v674_v27 = vadd.f32 %v1492_v23, %v673_v20 }
 0x187   :  { %v635_v21 = vpop.f32.mrf.mxu2  ;;  %v714_v31 = vmax.f32 %v674_v27, 0.0 }
 0x188   :  { %v636_v24 = vadd.f32 %v1492_v23, %v635_v21 }
 0x18a   :  { %v699_v26 = vmax.f32 %v636_v24, 0.0 }
 0x18c   :  { %v1096_v28 = vpack.c.bf16 %v699_v26, %v698_v25  ;;  %v675_v29 = vpop.f32.mrf.mxu3 }
 0x18d   :  { %v676_v30 = vadd.f32 %v1492_v23, %v675_v29 }
 0x18e   :  { %1152 = vst [vmem:[%s1578_s4 + $0x28] sm:$0xff] %v1096_v28  }
 0x18f   :  { %v715_v32 = vmax.f32 %v676_v30, 0.0  ;;  %v638_v33 = vpop.f32.mrf.mxu2 }
 0x190   :  { %v639_v36 = vadd.f32 %v1492_v23, %v638_v33 }
 0x191   :  { %v1136_v34 = vpack.c.bf16 %v715_v32, %v714_v31 }
 0x192   :  { %v700_v39 = vmax.f32 %v639_v36, 0.0 }
 0x193   :  { %1160 = vst [vmem:[%s1578_s4 + $0x68] sm:$0xff] %v1136_v34  }
 0x194   :  { %v678_v35 = vpop.f32.mrf.mxu3 }
 0x195   :  { %v679_v42 = vadd.f32 %v1492_v23, %v678_v35 }
 0x197   :  { %v640_v37 = vpop.f32.mrf.mxu2  ;;  %v716_v46 = vmax.f32 %v679_v42, 0.0 }
 0x198   :  { %v641_v38 = vadd.f32 %v1492_v23, %v640_v37 }
 0x19a   :  { %v701_v41 = vmax.f32 %v641_v38, 0.0 }
 0x19c   :  { %v1101_v43 = vpack.c.bf16 %v701_v41, %v700_v39  ;;  %v680_v44 = vpop.f32.mrf.mxu3 }
 0x19d   :  { %v681_v45 = vadd.f32 %v1492_v23, %v680_v44 }
 0x19e   :  { %1153 = vst [vmem:[%s1578_s4 + $0x30] sm:$0xff] %v1101_v43  }
 0x19f   :  { %v717_v47 = vmax.f32 %v681_v45, 0.0  ;;  %v643_v48 = vpop.f32.mrf.mxu2 }
 0x1a0   :  { %v644_v52 = vadd.f32 %v1492_v23, %v643_v48 }
 0x1a1   :  { %v1141_v49 = vpack.c.bf16 %v717_v47, %v716_v46 }
 0x1a2   :  { %v702_v40 = vmax.f32 %v644_v52, 0.0 }
 0x1a3   :  { %1161 = vst [vmem:[%s1578_s4 + $0x70] sm:$0xff] %v1141_v49  }
 0x1a4   :  { %v683_v51 = vpop.f32.mrf.mxu3 }
 0x1a5   :  { %v684_v56 = vadd.f32 %v1492_v23, %v683_v51 }
 0x1a7   :  { %v645_v53 = vpop.f32.mrf.mxu2  ;;  %v718_v60 = vmax.f32 %v684_v56, 0.0 }
 0x1a8   :  { %v646_v54 = vadd.f32 %v1492_v23, %v645_v53 }
 0x1aa   :  { %v703_v50 = vmax.f32 %v646_v54, 0.0 }
 0x1ac   :  { %v1106_v57 = vpack.c.bf16 %v703_v50, %v702_v40  ;;  %v685_v58 = vpop.f32.mrf.mxu3 }
 0x1ad   :  { %v686_v59 = vadd.f32 %v1492_v23, %v685_v58 }
 0x1ae   :  { %1154 = vst [vmem:[%s1578_s4 + $0x38] sm:$0xff] %v1106_v57  }
 0x1af   :  { %v719_v61 = vmax.f32 %v686_v59, 0.0  ;;  %v648_v62 = vpop.f32.mrf.mxu2 }
 0x1b0   :  { %v649_v0 = vadd.f32 %v1492_v23, %v648_v62 }
 0x1b1   :  { %v1146_v63 = vpack.c.bf16 %v719_v61, %v718_v60 }
 0x1b2   :  { %v704_v55 = vmax.f32 %v649_v0, 0.0 }
 0x1b3   :  { %1162 = vst [vmem:[%s1578_s4 + $0x78] sm:$0xff] %v1146_v63  }
 0x1b7   :  { %v650_v2 = vpop.f32.mrf.mxu2 }
 0x1b8   :  { %v651_v3 = vadd.f32 %v1492_v23, %v650_v2 }
 0x1ba   :  { %v705_v1 = vmax.f32 %v651_v3, 0.0 }
 0x1bc   :  { %v1111_v4 = vpack.c.bf16 %v705_v1, %v704_v55 }
 0x1be   :  { %1155 = vst [vmem:[%s1578_s4 + $0x40] sm:$0xff] %v1111_v4  }
 0x1bf   :  { %v653_v5 = vpop.f32.mrf.mxu2 }
 0x1c0   :  { %v654_v7 = vadd.f32 %v1492_v23, %v653_v5 }
 0x1c2   :  { %v706_v10 = vmax.f32 %v654_v7, 0.0 }
 0x1c7   :  { %v655_v8 = vpop.f32.mrf.mxu2 }
 0x1c8   :  { %v656_v9 = vadd.f32 %v1492_v23, %v655_v8 }
 0x1ca   :  { %v707_v11 = vmax.f32 %v656_v9, 0.0 }
 0x1cc   :  { %v1116_v12 = vpack.c.bf16 %v707_v11, %v706_v10 }
 0x1ce   :  { %1156 = vst [vmem:[%s1578_s4 + $0x48] sm:$0xff] %v1116_v12  }
 0x1cf   :  { %v658_v13 = vpop.f32.mrf.mxu2 }
 0x1d0   :  { %v659_v14 = vadd.f32 %v1492_v23, %v658_v13 }
 0x1d2   :  { %v708_v16 = vmax.f32 %v659_v14, 0.0 }
 0x1d7   :  { %v660_v6 = vpop.f32.mrf.mxu2 }
 0x1d8   :  { %v661_v15 = vadd.f32 %v1492_v23, %v660_v6 }
 0x1da   :  { %v709_v17 = vmax.f32 %v661_v15, 0.0 }
 0x1dc   :  { %v1121_v18 = vpack.c.bf16 %v709_v17, %v708_v16 }
 0x1de   :  { %1157 = vst [vmem:[%s1578_s4 + $0x50] sm:$0xff] %v1121_v18  }
 0x1df   :  { %v663_v19 = vpop.f32.mrf.mxu2 }
 0x1e0   :  { %v664_v20 = vadd.f32 %v1492_v23, %v663_v19 }
 0x1e2   :  { %v710_v24 = vmax.f32 %v664_v20, 0.0 }
 0x1e7   :  { %v665_v22 = vpop.f32.mrf.mxu2 }
 0x1e8   :  { %v666_v21 = vadd.f32 %v1492_v23, %v665_v22 }
 0x1ea   :  { %v711_v25 = vmax.f32 %v666_v21, 0.0 }
 0x1ec   :  { %v1126_v26 = vpack.c.bf16 %v711_v25, %v710_v24 }
 0x1ee   :  { %1158 = vst [vmem:[%s1578_s4 + $0x58] sm:$0xff] %v1126_v26  }

// kernel: gcn_forward.7
= control target key start
LH: loop header
LB: loop body
LE: loop exit
PB: predicated region body
PF: predicated region fallthrough
CT: control target
= control target key end

     0   :  { %s221_s1 = inlined_call_operand.vmem [shape: f32[256,128], index: 1, kind: input, shape index: {}]   ;;  %s222_s0 = inlined_call_operand.vmem [shape: f32[8,256], index: 0, kind: input, shape index: {}]   ;;  %s223_s2 = inlined_call_operand.vmem [shape: f32[8,128], index: 2, kind: output, shape index: {}]  }
   0x1   :  { %v28_v0 = vld [vmem:[%s221_s1 + $0x78] sm:$0xff]  ;;  %v27_v2 = vld [vmem:[%s221_s1 + $0x70] sm:$0xff]  ;;  %v26_v4 = vld [vmem:[%s221_s1 + $0x68] sm:$0xff] }
   0x2   :  { %v44_v1 = vld [vmem:[%s221_s1 + $0xf8] sm:$0xff]  ;;  %45 = vmatpush.msra.mxu0 %v28_v0  ;;  %v43_v3 = vld [vmem:[%s221_s1 + $0xf0] sm:$0xff]  ;;  %v42_v5 = vld [vmem:[%s221_s1 + $0xe8] sm:$0xff] }
   0x3   :  { %65 = vmatpush.msra.mxu1 %v44_v1  ;;  %v25_v6 = vld [vmem:[%s221_s1 + $0x60] sm:$0xff]  ;;  %v24_v8 = vld [vmem:[%s221_s1 + $0x58] sm:$0xff]  ;;  %v23_v10 = vld [vmem:[%s221_s1 + $0x50] sm:$0xff] }
   0x4   :  { %46 = vmatpush.msra.mxu0 %v27_v2  ;;  %v41_v7 = vld [vmem:[%s221_s1 + $0xe0] sm:$0xff]  ;;  %v40_v9 = vld [vmem:[%s221_s1 + $0xd8] sm:$0xff]  ;;  %v39_v11 = vld [vmem:[%s221_s1 + $0xd0] sm:$0xff] }
   0x5   :  { %66 = vmatpush.msra.mxu1 %v43_v3  ;;  %v22_v12 = vld [vmem:[%s221_s1 + $0x48] sm:$0xff]  ;;  %v21_v14 = vld [vmem:[%s221_s1 + $0x40] sm:$0xff]  ;;  %v20_v16 = vld [vmem:[%s221_s1 + $0x38] sm:$0xff] }
   0x6   :  { %47 = vmatpush.msra.mxu0 %v26_v4  ;;  %v38_v13 = vld [vmem:[%s221_s1 + $0xc8] sm:$0xff]  ;;  %v37_v15 = vld [vmem:[%s221_s1 + $0xc0] sm:$0xff]  ;;  %v36_v17 = vld [vmem:[%s221_s1 + $0xb8] sm:$0xff] }
   0x7   :  { %67 = vmatpush.msra.mxu1 %v42_v5  ;;  %v19_v18 = vld [vmem:[%s221_s1 + $0x30] sm:$0xff]  ;;  %v18_v20 = vld [vmem:[%s221_s1 + $0x28] sm:$0xff]  ;;  %v17_v22 = vld [vmem:[%s221_s1 + $0x20] sm:$0xff] }
   0x8   :  { %48 = vmatpush.msra.mxu0 %v25_v6  ;;  %v35_v19 = vld [vmem:[%s221_s1 + $0xb0] sm:$0xff]  ;;  %v34_v21 = vld [vmem:[%s221_s1 + $0xa8] sm:$0xff]  ;;  %v33_v23 = vld [vmem:[%s221_s1 + $0xa0] sm:$0xff] }
   0x9   :  { %68 = vmatpush.msra.mxu1 %v41_v7  ;;  %v16_v24 = vld [vmem:[%s221_s1 + $0x18] sm:$0xff]  ;;  %v15_v26 = vld [vmem:[%s221_s1 + $0x10] sm:$0xff]  ;;  %v14_v28 = vld [vmem:[%s221_s1 + $0x8] sm:$0xff] }
   0xa   :  { %49 = vmatpush.msra.mxu0 %v24_v8  ;;  %v32_v25 = vld [vmem:[%s221_s1 + $0x98] sm:$0xff]  ;;  %v31_v27 = vld [vmem:[%s221_s1 + $0x90] sm:$0xff]  ;;  %v30_v29 = vld [vmem:[%s221_s1 + $0x88] sm:$0xff] }
   0xb   :  { %69 = vmatpush.msra.mxu1 %v40_v9  ;;  %v13_v30 = vld [vmem:[%s221_s1] sm:$0xff]  ;;  %v12_v33 = vld [vmem:[%s222_s0 + $0x8] sm:$0xff] }
   0xc   :  { %50 = vmatpush.msra.mxu0 %v23_v10  ;;  %v29_v31 = vld [vmem:[%s221_s1 + $0x80] sm:$0xff] }
   0xd   :  { %70 = vmatpush.msra.mxu1 %v39_v11  ;;  %v11_v32 = vld [vmem:[%s222_s0] sm:$0xff] }
   0xe   :  { %51 = vmatpush.msra.mxu0 %v22_v12 }
   0xf   :  { %71 = vmatpush.msra.mxu1 %v38_v13 }
  0x10   :  { %52 = vmatpush.msra.mxu0 %v21_v14 }
  0x11   :  { %72 = vmatpush.msra.mxu1 %v37_v15 }
  0x12   :  { %53 = vmatpush.msra.mxu0 %v20_v16 }
  0x13   :  { %73 = vmatpush.msra.mxu1 %v36_v17 }
  0x14   :  { %54 = vmatpush.msra.mxu0 %v19_v18 }
  0x15   :  { %74 = vmatpush.msra.mxu1 %v35_v19 }
  0x16   :  { %55 = vmatpush.msra.mxu0 %v18_v20 }
  0x17   :  { %75 = vmatpush.msra.mxu1 %v34_v21 }
  0x18   :  { %56 = vmatpush.msra.mxu0 %v17_v22 }
  0x19   :  { %76 = vmatpush.msra.mxu1 %v33_v23 }
  0x1a   :  { %57 = vmatpush.msra.mxu0 %v16_v24 }
  0x1b   :  { %77 = vmatpush.msra.mxu1 %v32_v25 }
  0x1c   :  { %58 = vmatpush.msra.mxu0 %v15_v26 }
  0x1d   :  { %78 = vmatpush.msra.mxu1 %v31_v27 }
  0x1e   :  { %59 = vmatpush.msra.mxu0 %v14_v28 }
  0x1f   :  { %79 = vmatpush.msra.mxu1 %v30_v29 }
  0x20   :  { %60 = vmatpush.msra.mxu0 %v13_v30 }
  0x21   :  { %80 = vmatpush.msra.mxu1 %v29_v31  ;;  %61 = vmatmul.f32.vlgmr.msra.gmra.mxu0 %v11_v32 }
  0x22   :  { %81 = vmatmul.f32.vlgmr.msra.gmra.mxu1 %v12_v33 }
  0x9e   :  { %v62_v34 = vpop.f32.mrf.mxu0 }
  0x9f   :  { %v82_v35 = vpop.f32.mrf.mxu1 }
  0xa0   :  { %v83_v36 = vadd.f32 %v82_v35, %v62_v34 }
  0xa2   :  { %89 = vst [vmem:[%s223_s2] sm:$0xff] %v83_v36 }

// kernel: gcn_forward.6
= control target key start
LH: loop header
LB: loop body
LE: loop exit
PB: predicated region body
PF: predicated region fallthrough
CT: control target
= control target key end

     0   :  { %s1463_s1 = inlined_call_operand.vmem [shape: bf16[256,128], index: 1, kind: input, shape index: {}]   ;;  %s1464_s0 = inlined_call_operand.vmem [shape: bf16[256,256], index: 0, kind: input, shape index: {}]   ;;  %s1465_s2 = inlined_call_operand.vmem [shape: bf16[128,128], index: 2, kind: input, shape index: {}]   ;;  %s1466_s3 = inlined_call_operand.vmem [shape: f32[1,128], index: 3, kind: input, shape index: {}]   ;;  %s1467_s4 = inlined_call_operand.vmem [shape: f32[256,128], index: 4, kind: output, shape index: {}]  }
   0x1   :  { %v987_v0 = vld [vmem:[%s1463_s1 + $0x38] sm:$0xff]  ;;  %v986_v2 = vld [vmem:[%s1463_s1 + $0x30] sm:$0xff]  ;;  %v985_v4 = vld [vmem:[%s1463_s1 + $0x28] sm:$0xff] }
   0x2   :  { %v995_v1 = vld [vmem:[%s1463_s1 + $0x78] sm:$0xff]  ;;  %337 = vmatpush.bf16.msra.mxu0 %v987_v0  ;;  %1004 = vmatpush.bf16.msra.mxu3 %v987_v0  ;;  %v994_v3 = vld [vmem:[%s1463_s1 + $0x70] sm:$0xff]  ;;  %v993_v5 = vld [vmem:[%s1463_s1 + $0x68] sm:$0xff] }
   0x3   :  { %426 = vmatpush.bf16.msra.mxu1 %v995_v1  ;;  %v984_v6 = vld [vmem:[%s1463_s1 + $0x20] sm:$0xff]  ;;  %v983_v8 = vld [vmem:[%s1463_s1 + $0x18] sm:$0xff]  ;;  %v982_v10 = vld [vmem:[%s1463_s1 + $0x10] sm:$0xff] }
   0x4   :  { %v992_v7 = vld [vmem:[%s1463_s1 + $0x60] sm:$0xff]  ;;  %v991_v9 = vld [vmem:[%s1463_s1 + $0x58] sm:$0xff]  ;;  %v990_v11 = vld [vmem:[%s1463_s1 + $0x50] sm:$0xff] }
   0x5   :  { %v981_v12 = vld [vmem:[%s1463_s1 + $0x8] sm:$0xff]  ;;  %v980_v14 = vld [vmem:[%s1463_s1] sm:$0xff]  ;;  %v734_v25 = vld [vmem:[%s1464_s0 + $0x10] sm:$0xf] }
   0x6   :  { %338 = vmatpush.bf16.msra.mxu0 %v986_v2  ;;  %1005 = vmatpush.bf16.msra.mxu3 %v986_v2  ;;  %v989_v13 = vld [vmem:[%s1463_s1 + $0x48] sm:$0xff]  ;;  %v726_v15 = vld [vmem:[%s1464_s0] sm:$0xf]  ;;  %v948_v20 = vld [vmem:[%s1464_s0 + $0x4] sm:$0xf] }
   0x7   :  { %427 = vmatpush.bf16.msra.mxu1 %v994_v3  ;;  %v949_v16 = vld [vmem:[%s1464_s0 + $0x4] sm:$0xf0]  ;;  %v822_v17 = vld [vmem:[%s1464_s0 + $0xc0] sm:$0xf]  ;;  %v728_v21 = vld [vmem:[%s1464_s0 + $0x8] sm:$0xf0] }
   0x8   :  { %v973_v18 = vld [vmem:[%s1464_s0 + $0xc4] sm:$0xf0]  ;;  %v988_v19 = vld [vmem:[%s1463_s1 + $0x40] sm:$0xff]  ;;  %v727_v22 = vor.u32 %v949_v16, %v726_v15  ;;  %v731_v24 = vor.u32 %v948_v20, %v728_v21  ;;  %v951_v26 = vld [vmem:[%s1464_s0 + $0x14] sm:$0xf0] }
   0x9   :  { %v823_v23 = vor.u32 %v973_v18, %v822_v17  ;;  %v830_v27 = vld [vmem:[%s1464_s0 + $0xd0] sm:$0xf]  ;;  %v975_v28 = vld [vmem:[%s1464_s0 + $0xd4] sm:$0xf0]  ;;  %v950_v29 = vld [vmem:[%s1464_s0 + $0x14] sm:$0xf]  ;;  %v735_v31 = vor.u32 %v951_v26, %v734_v25 }
   0xa   :  { %339 = vmatpush.bf16.msra.mxu0 %v985_v4  ;;  %1006 = vmatpush.bf16.msra.mxu3 %v985_v4  ;;  %v736_v30 = vld [vmem:[%s1464_s0 + $0x18] sm:$0xf0]  ;;  %v831_v32 = vor.u32 %v975_v28, %v830_v27  ;;  %v742_v34 = vld [vmem:[%s1464_s0 + $0x20] sm:$0xf]  ;;  %v953_v35 = vld [vmem:[%s1464_s0 + $0x24] sm:$0xf0] }
   0xb   :  { %428 = vmatpush.bf16.msra.mxu1 %v993_v5  ;;  %v739_v33 = vor.u32 %v950_v29, %v736_v30  ;;  %v838_v36 = vld [vmem:[%s1464_s0 + $0xe0] sm:$0xf]  ;;  %v977_v37 = vld [vmem:[%s1464_s0 + $0xe4] sm:$0xf0]  ;;  %v952_v38 = vld [vmem:[%s1464_s0 + $0x24] sm:$0xf]  ;;  %v743_v40 = vor.u32 %v953_v35, %v742_v34 }
   0xc   :  { %v744_v39 = vld [vmem:[%s1464_s0 + $0x28] sm:$0xf0]  ;;  %v839_v41 = vor.u32 %v977_v37, %v838_v36  ;;  %v750_v43 = vld [vmem:[%s1464_s0 + $0x30] sm:$0xf]  ;;  %v955_v44 = vld [vmem:[%s1464_s0 + $0x34] sm:$0xf0] }
   0xd   :  { %v747_v42 = vor.u32 %v952_v38, %v744_v39  ;;  %v846_v45 = vld [vmem:[%s1464_s0 + $0xf0] sm:$0xf]  ;;  %v979_v46 = vld [vmem:[%s1464_s0 + $0xf4] sm:$0xf0]  ;;  %v954_v47 = vld [vmem:[%s1464_s0 + $0x34] sm:$0xf]  ;;  %v751_v49 = vor.u32 %v955_v44, %v750_v43 }
   0xe   :  { %340 = vmatpush.bf16.msra.mxu0 %v984_v6  ;;  %1007 = vmatpush.bf16.msra.mxu3 %v984_v6  ;;  %v752_v48 = vld [vmem:[%s1464_s0 + $0x38] sm:$0xf0]  ;;  %v847_v50 = vor.u32 %v979_v46, %v846_v45  ;;  %v758_v52 = vld [vmem:[%s1464_s0 + $0x40] sm:$0xf]  ;;  %v957_v53 = vld [vmem:[%s1464_s0 + $0x44] sm:$0xf0] }
   0xf   :  { %429 = vmatpush.bf16.msra.mxu1 %v992_v7  ;;  %v755_v51 = vor.u32 %v954_v47, %v752_v48  ;;  %v972_v54 = vld [vmem:[%s1464_s0 + $0xc4] sm:$0xf]  ;;  %v824_v55 = vld [vmem:[%s1464_s0 + $0xc8] sm:$0xf0]  ;;  %v759_v58 = vor.u32 %v957_v53, %v758_v52  ;;  %v1003_v61 = vld [vmem:[%s1465_s2 + $0x38] sm:$0xff] }
  0x10   :  { %v956_v56 = vld [vmem:[%s1464_s0 + $0x44] sm:$0xf]  ;;  %v760_v57 = vld [vmem:[%s1464_s0 + $0x48] sm:$0xf0]  ;;  %v827_v59 = vor.u32 %v972_v54, %v824_v55  ;;  %599 = vmatpush.bf16.msra.mxu2 %v1003_v61  ;;  %v1002_v62 = vld [vmem:[%s1465_s2 + $0x30] sm:$0xff] }
  0x11   :  { %v763_v60 = vor.u32 %v956_v56, %v760_v57  ;;  %v766_v63 = vld [vmem:[%s1464_s0 + $0x50] sm:$0xf]  ;;  %v959_v0 = vld [vmem:[%s1464_s0 + $0x54] sm:$0xf0]  ;;  %v832_v2 = vld [vmem:[%s1464_s0 + $0xd8] sm:$0xf0] }
  0x12   :  { %341 = vmatpush.bf16.msra.mxu0 %v983_v8  ;;  %1008 = vmatpush.bf16.msra.mxu3 %v983_v8  ;;  %v768_v4 = vld [vmem:[%s1464_s0 + $0x58] sm:$0xf0]  ;;  %v1001_v8 = vld [vmem:[%s1465_s2 + $0x28] sm:$0xff]  ;;  %v960_v15 = vld [vmem:[%s1464_s0 + $0x64] sm:$0xf] }
  0x13   :  { %430 = vmatpush.bf16.msra.mxu1 %v991_v9  ;;  %v776_v16 = vld [vmem:[%s1464_s0 + $0x68] sm:$0xf0]  ;;  %v998_v20 = vld [vmem:[%s1465_s2 + $0x10] sm:$0xff]  ;;  %v848_v26 = vld [vmem:[%s1464_s0 + $0xf8] sm:$0xf0] }
  0x14   :  { %600 = vmatpush.bf16.msra.mxu2 %v1002_v62  ;;  %v997_v21 = vld [vmem:[%s1465_s2 + $0x8] sm:$0xff]  ;;  %v978_v25 = vld [vmem:[%s1464_s0 + $0xf4] sm:$0xf]  ;;  %v784_v28 = vld [vmem:[%s1464_s0 + $0x78] sm:$0xf0] }
  0x15   :  { %v962_v27 = vld [vmem:[%s1464_s0 + $0x74] sm:$0xf]  ;;  %v851_v30 = vor.u32 %v978_v25, %v848_v26  ;;  %v964_v34 = vld [vmem:[%s1464_s0 + $0x84] sm:$0xf]  ;;  %v792_v35 = vld [vmem:[%s1464_s0 + $0x88] sm:$0xf0] }
  0x16   :  { %342 = vmatpush.bf16.msra.mxu0 %v982_v10  ;;  %1009 = vmatpush.bf16.msra.mxu3 %v982_v10  ;;  %v999_v10 = vld [vmem:[%s1465_s2 + $0x18] sm:$0xff]  ;;  %v795_v38 = vor.u32 %v964_v34, %v792_v35  ;;  %v798_v46 = vld [vmem:[%s1464_s0 + $0x90] sm:$0xf]  ;;  %v966_v48 = vld [vmem:[%s1464_s0 + $0x94] sm:$0xf] }
  0x17   :  { %431 = vmatpush.bf16.msra.mxu1 %v990_v11  ;;  %v967_v47 = vld [vmem:[%s1464_s0 + $0x94] sm:$0xf0] }
  0x18   :  { %601 = vmatpush.bf16.msra.mxu2 %v1001_v8 }
  0x1a   :  { %343 = vmatpush.bf16.msra.mxu0 %v981_v12  ;;  %1010 = vmatpush.bf16.msra.mxu3 %v981_v12  ;;  %v961_v12 = vld [vmem:[%s1464_s0 + $0x64] sm:$0xf0] }
  0x1b   :  { %432 = vmatpush.bf16.msra.mxu1 %v989_v13 }
  0x1e   :  { %344 = vmatpush.bf16.msra.mxu0 %v980_v14  ;;  %1011 = vmatpush.bf16.msra.mxu3 %v980_v14  ;;  %v840_v14 = vld [vmem:[%s1464_s0 + $0xe8] sm:$0xf0] }
  0x1f   :  { %433 = vmatpush.bf16.msra.mxu1 %v988_v19 }
  0x21   :  { %345 = vmatmul.bf16.vlgmr.msra.gmra.mxu0 %v727_v22  ;;  %405 = vmatmul.bf16.vlgmr.msra.gmra.mxu3 %v823_v23  ;;  %v996_v22 = vld [vmem:[%s1465_s2] sm:$0xff]  ;;  %v782_v23 = vld [vmem:[%s1464_s0 + $0x70] sm:$0xf] }
  0x22   :  { %1012 = vmatpush.bf16.msrb.mxu3 %v995_v1  ;;  %434 = vmatmul.bf16.vlgmr.msra.gmra.mxu1 %v731_v24  ;;  %v974_v1 = vld [vmem:[%s1464_s0 + $0xd4] sm:$0xf]  ;;  %v963_v24 = vld [vmem:[%s1464_s0 + $0x74] sm:$0xf0] }
  0x23   :  { %v835_v6 = vor.u32 %v974_v1, %v832_v2  ;;  %v783_v29 = vor.u32 %v963_v24, %v782_v23 }
  0x26   :  { %1013 = vmatpush.bf16.msrb.mxu3 %v994_v3  ;;  %v958_v3 = vld [vmem:[%s1464_s0 + $0x54] sm:$0xf] }
  0x2a   :  { %1014 = vmatpush.bf16.msrb.mxu3 %v993_v5  ;;  %v767_v5 = vor.u32 %v959_v0, %v766_v63  ;;  %v968_v63 = vld [vmem:[%s1464_s0 + $0xa4] sm:$0xf]  ;;  %v808_v0 = vld [vmem:[%s1464_s0 + $0xa8] sm:$0xf0] }
  0x2e   :  { %1015 = vmatpush.bf16.msrb.mxu3 %v992_v7  ;;  %v771_v7 = vor.u32 %v958_v3, %v768_v4  ;;  %v811_v4 = vor.u32 %v968_v63, %v808_v0 }
  0x31   :  { %350 = vmatmul.bf16.gmra.mxu0 %v735_v31  ;;  %410 = vmatmul.bf16.gmra.mxu3 %v831_v32  ;;  %v787_v31 = vor.u32 %v962_v27, %v784_v28  ;;  %v790_v32 = vld [vmem:[%s1464_s0 + $0x80] sm:$0xf] }
  0x32   :  { %1016 = vmatpush.bf16.msrb.mxu3 %v991_v9  ;;  %439 = vmatmul.bf16.gmra.mxu1 %v739_v33  ;;  %v1000_v9 = vld [vmem:[%s1465_s2 + $0x20] sm:$0xff]  ;;  %v965_v33 = vld [vmem:[%s1464_s0 + $0x84] sm:$0xf0] }
  0x33   :  { %602 = vmatpush.bf16.msra.mxu2 %v1000_v9  ;;  %v791_v36 = vor.u32 %v965_v33, %v790_v32 }
  0x36   :  { %1017 = vmatpush.bf16.msrb.mxu3 %v990_v11  ;;  %v774_v11 = vld [vmem:[%s1464_s0 + $0x60] sm:$0xf] }
  0x37   :  { %603 = vmatpush.bf16.msra.mxu2 %v999_v10  ;;  %v775_v17 = vor.u32 %v961_v12, %v774_v11  ;;  %v814_v12 = vld [vmem:[%s1464_s0 + $0xb0] sm:$0xf] }
  0x3a   :  { %1018 = vmatpush.bf16.msrb.mxu3 %v989_v13  ;;  %v976_v13 = vld [vmem:[%s1464_s0 + $0xe4] sm:$0xf] }
  0x3b   :  { %v843_v18 = vor.u32 %v976_v13, %v840_v14  ;;  %604 = vmatpush.bf16.msra.mxu2 %v998_v20  ;;  %v971_v13 = vld [vmem:[%s1464_s0 + $0xb4] sm:$0xf0]  ;;  %v970_v14 = vld [vmem:[%s1464_s0 + $0xb4] sm:$0xf] }
  0x3e   :  { %1019 = vmatpush.bf16.msrb.mxu3 %v988_v19  ;;  %v779_v19 = vor.u32 %v960_v15, %v776_v16  ;;  %v816_v15 = vld [vmem:[%s1464_s0 + $0xb8] sm:$0xf0] }
  0x3f   :  { %605 = vmatpush.bf16.msra.mxu2 %v997_v21 }
  0x41   :  { %355 = vmatmul.bf16.gmra.mxu0 %v743_v40  ;;  %415 = vmatmul.bf16.gmra.mxu3 %v839_v41 }
  0x42   :  { %444 = vmatmul.bf16.gmra.mxu1 %v747_v42  ;;  %1020 = vmatpush.bf16.msra.mxu3 %v1003_v61  ;;  %v806_v61 = vld [vmem:[%s1464_s0 + $0xa0] sm:$0xf] }
  0x43   :  { %606 = vmatpush.bf16.msra.mxu2 %v996_v22 }
  0x46   :  { %1021 = vmatpush.bf16.msra.mxu3 %v1002_v62  ;;  %v969_v62 = vld [vmem:[%s1464_s0 + $0xa4] sm:$0xf0] }
  0x47   :  { %v807_v2 = vor.u32 %v969_v62, %v806_v61 }
  0x4a   :  { %1022 = vmatpush.bf16.msra.mxu3 %v1001_v8 }
  0x4e   :  { %1023 = vmatpush.bf16.msra.mxu3 %v1000_v9 }
  0x51   :  { %360 = vmatmul.bf16.gmra.mxu0 %v751_v49  ;;  %420 = vmatmul.bf16.gmra.mxu3 %v847_v50  ;;  %v800_v49 = vld [vmem:[%s1464_s0 + $0x98] sm:$0xf0] }
  0x52   :  { %449 = vmatmul.bf16.gmra.mxu1 %v755_v51  ;;  %1024 = vmatpush.bf16.msra.mxu3 %v999_v10  ;;  %v799_v51 = vor.u32 %v967_v47, %v798_v46  ;;  %v803_v53 = vor.u32 %v966_v48, %v800_v49 }
  0x56   :  { %1025 = vmatpush.bf16.msra.mxu3 %v998_v20 }
  0x5a   :  { %1026 = vmatpush.bf16.msra.mxu3 %v997_v21 }
  0x5e   :  { %1027 = vmatpush.bf16.msra.mxu3 %v996_v22 }
  0x61   :  { %365 = vmatmul.bf16.gmra.mxu0 %v759_v58  ;;  %494 = vmatmul.bf16.vlgmr.msrb.gmra.mxu3 %v827_v59 }
  0x62   :  { %454 = vmatmul.bf16.gmra.mxu1 %v763_v60 }
  0x71   :  { %370 = vmatmul.bf16.gmra.mxu0 %v767_v5  ;;  %499 = vmatmul.bf16.gmra.mxu3 %v835_v6 }
  0x72   :  { %459 = vmatmul.bf16.gmra.mxu1 %v771_v7 }
  0x81   :  { %375 = vmatmul.bf16.gmra.mxu0 %v775_v17  ;;  %504 = vmatmul.bf16.gmra.mxu3 %v843_v18  ;;  %v815_v17 = vor.u32 %v971_v13, %v814_v12 }
  0x82   :  { %464 = vmatmul.bf16.gmra.mxu1 %v779_v19  ;;  %v819_v19 = vor.u32 %v970_v14, %v816_v15 }
  0x91   :  { %380 = vmatmul.bf16.gmra.mxu0 %v783_v29  ;;  %509 = vmatmul.bf16.gmra.mxu3 %v851_v30 }
  0x92   :  { %469 = vmatmul.bf16.gmra.mxu1 %v787_v31 }
  0x9e   :  { %v346_v37 = vpop.f32.mrf.mxu0 }
  0x9f   :  { %v435_v39 = vpop.f32.mrf.mxu1 }
  0xa0   :  { %v436_v43 = vadd.f32 %v435_v39, %v346_v37 }
  0xa1   :  { %385 = vmatmul.bf16.gmra.mxu0 %v791_v36 }
  0xa2   :  { %474 = vmatmul.bf16.gmra.mxu1 %v795_v38 }
  0xa4   :  { %v1282_v40 = vpop.f32.mrf.mxu3 }
  0xa6   :  { %v348_v41 = vpop.f32.mrf.mxu0 }
  0xa7   :  { %v437_v42 = vpop.f32.mrf.mxu1 }
  0xa8   :  { %v438_v44 = vadd.f32 %v437_v42, %v348_v41 }
  0xaa   :  { %v515_v45 = vpack.c.bf16 %v438_v44, %v436_v43 }
  0xac   :  { %607 = vmatmul.bf16.vlgmr.msra.gmra.mxu2 %v515_v45  ;;  %v1296_v50 = vpop.f32.mrf.mxu3 }
  0xae   :  { %v351_v52 = vpop.f32.mrf.mxu0 }
  0xaf   :  { %v440_v54 = vpop.f32.mrf.mxu1 }
  0xb0   :  { %v441_v58 = vadd.f32 %v440_v54, %v351_v52 }
  0xb1   :  { %390 = vmatmul.bf16.gmra.mxu0 %v799_v51 }
  0xb2   :  { %479 = vmatmul.bf16.gmra.mxu1 %v803_v53 }
  0xb4   :  { %v1298_v55 = vpop.f32.mrf.mxu3 }
  0xb6   :  { %v353_v56 = vpop.f32.mrf.mxu0 }
  0xb7   :  { %v442_v57 = vpop.f32.mrf.mxu1 }
  0xb8   :  { %v443_v59 = vadd.f32 %v442_v57, %v353_v56 }
  0xba   :  { %v516_v60 = vpack.c.bf16 %v443_v59, %v441_v58 }
  0xbc   :  { %612 = vmatmul.bf16.gmra.mxu2 %v516_v60  ;;  %v413_v1 = vpop.f32.mrf.mxu3 }
  0xbe   :  { %v356_v3 = vpop.f32.mrf.mxu0 }
  0xbf   :  { %v445_v5 = vpop.f32.mrf.mxu1 }
  0xc0   :  { %v446_v9 = vadd.f32 %v445_v5, %v356_v3 }
  0xc1   :  { %395 = vmatmul.bf16.gmra.mxu0 %v807_v2 }
  0xc2   :  { %484 = vmatmul.bf16.gmra.mxu1 %v811_v4 }
  0xc4   :  { %v1312_v6 = vpop.f32.mrf.mxu3 }
  0xc6   :  { %v358_v7 = vpop.f32.mrf.mxu0 }
  0xc7   :  { %v447_v8 = vpop.f32.mrf.mxu1 }
  0xc8   :  { %v448_v10 = vadd.f32 %v447_v8, %v358_v7 }
  0xca   :  { %v517_v11 = vpack.c.bf16 %v448_v10, %v446_v9 }
  0xcc   :  { %617 = vmatmul.bf16.gmra.mxu2 %v517_v11  ;;  %v418_v16 = vpop.f32.mrf.mxu3 }
  0xce   :  { %v361_v18 = vpop.f32.mrf.mxu0 }
  0xcf   :  { %v450_v20 = vpop.f32.mrf.mxu1 }
  0xd0   :  { %v451_v24 = vadd.f32 %v450_v20, %v361_v18 }
  0xd1   :  { %400 = vmatmul.bf16.gmra.mxu0 %v815_v17 }
  0xd2   :  { %489 = vmatmul.bf16.gmra.mxu1 %v819_v19  ;;  %v1333_v19 = vld [vmem:[%s1466_s3] ss:$0 sm:$0xff] }
  0xd4   :  { %v421_v21 = vpop.f32.mrf.mxu3 }
  0xd6   :  { %v363_v22 = vpop.f32.mrf.mxu0 }
  0xd7   :  { %v452_v23 = vpop.f32.mrf.mxu1 }
  0xd8   :  { %v453_v25 = vadd.f32 %v452_v23, %v363_v22 }
  0xda   :  { %v518_v26 = vpack.c.bf16 %v453_v25, %v451_v24 }
  0xdc   :  { %622 = vmatmul.bf16.gmra.mxu2 %v518_v26  ;;  %v423_v27 = vpop.f32.mrf.mxu3 }
  0xde   :  { %v366_v28 = vpop.f32.mrf.mxu0 }
  0xdf   :  { %v455_v29 = vpop.f32.mrf.mxu1 }
  0xe0   :  { %v456_v33 = vadd.f32 %v455_v29, %v366_v28 }
  0xe4   :  { %v495_v30 = vpop.f32.mrf.mxu3 }
  0xe5   :  { %v496_v37 = vadd.f32 %v495_v30, %v1282_v40 }
  0xe6   :  { %v368_v31 = vpop.f32.mrf.mxu0 }
  0xe7   :  { %v457_v32 = vpop.f32.mrf.mxu1 }
  0xe8   :  { %v458_v34 = vadd.f32 %v457_v32, %v368_v31 }
  0xea   :  { %v519_v35 = vpack.c.bf16 %v458_v34, %v456_v33 }
  0xec   :  { %627 = vmatmul.bf16.gmra.mxu2 %v519_v35  ;;  %v497_v36 = vpop.f32.mrf.mxu3 }
  0xed   :  { %v498_v38 = vadd.f32 %v497_v36, %v1296_v50 }
  0xee   :  { %v371_v39 = vpop.f32.mrf.mxu0 }
  0xef   :  { %v527_v41 = vpack.c.bf16 %v498_v38, %v496_v37  ;;  %v460_v42 = vpop.f32.mrf.mxu1 }
  0xf0   :  { %v461_v46 = vadd.f32 %v460_v42, %v371_v39 }
  0xf1   :  { %667 = vmatmul.bf16.vlgmr.msra.gmra.mxu3 %v527_v41 }
  0xf4   :  { %v500_v43 = vpop.f32.mrf.mxu3 }
  0xf5   :  { %v501_v51 = vadd.f32 %v500_v43, %v1298_v55 }
  0xf6   :  { %v373_v44 = vpop.f32.mrf.mxu0 }
  0xf7   :  { %v462_v45 = vpop.f32.mrf.mxu1 }
  0xf8   :  { %v463_v47 = vadd.f32 %v462_v45, %v373_v44 }
  0xfa   :  { %v520_v48 = vpack.c.bf16 %v463_v47, %v461_v46 }
  0xfc   :  { %632 = vmatmul.bf16.gmra.mxu2 %v520_v48  ;;  %v502_v49 = vpop.f32.mrf.mxu3 }
  0xfd   :  { %v503_v52 = vadd.f32 %v502_v49, %v413_v1 }
  0xfe   :  { %v376_v53 = vpop.f32.mrf.mxu0 }
  0xff   :  { %v465_v54 = vpop.f32.mrf.mxu1  ;;  %v528_v40 = vpack.c.bf16 %v503_v52, %v501_v51 }
 0x100   :  { %v466_v58 = vadd.f32 %v465_v54, %v376_v53 }
 0x101   :  { %672 = vmatmul.bf16.gmra.mxu3 %v528_v40 }
 0x104   :  { %v505_v50 = vpop.f32.mrf.mxu3 }
 0x105   :  { %v506_v62 = vadd.f32 %v505_v50, %v1312_v6 }
 0x106   :  { %v378_v56 = vpop.f32.mrf.mxu0 }
 0x107   :  { %v467_v57 = vpop.f32.mrf.mxu1 }
 0x108   :  { %v468_v59 = vadd.f32 %v467_v57, %v378_v56 }
 0x10a   :  { %v521_v60 = vpack.c.bf16 %v468_v59, %v466_v58 }
 0x10c   :  { %637 = vmatmul.bf16.gmra.mxu2 %v521_v60  ;;  %v507_v61 = vpop.f32.mrf.mxu3 }
 0x10d   :  { %v508_v63 = vadd.f32 %v507_v61, %v418_v16 }
 0x10e   :  { %v381_v0 = vpop.f32.mrf.mxu0 }
 0x10f   :  { %v470_v2 = vpop.f32.mrf.mxu1  ;;  %v529_v3 = vpack.c.bf16 %v508_v63, %v506_v62 }
 0x110   :  { %v471_v5 = vadd.f32 %v470_v2, %v381_v0 }
 0x111   :  { %677 = vmatmul.bf16.gmra.mxu3 %v529_v3 }
 0x114   :  { %v510_v55 = vpop.f32.mrf.mxu3 }
 0x115   :  { %v511_v10 = vadd.f32 %v510_v55, %v421_v21 }
 0x116   :  { %v383_v1 = vpop.f32.mrf.mxu0 }
 0x117   :  { %v472_v4 = vpop.f32.mrf.mxu1 }
 0x118   :  { %v473_v7 = vadd.f32 %v472_v4, %v383_v1 }
 0x11a   :  { %v522_v8 = vpack.c.bf16 %v473_v7, %v471_v5 }
 0x11c   :  { %642 = vmatmul.bf16.gmra.mxu2 %v522_v8  ;;  %v512_v9 = vpop.f32.mrf.mxu3 }
 0x11d   :  { %v513_v11 = vadd.f32 %v512_v9, %v423_v27 }
 0x11e   :  { %v386_v12 = vpop.f32.mrf.mxu0 }
 0x11f   :  { %v475_v13 = vpop.f32.mrf.mxu1  ;;  %v530_v14 = vpack.c.bf16 %v513_v11, %v511_v10 }
 0x120   :  { %v476_v16 = vadd.f32 %v475_v13, %v386_v12 }
 0x121   :  { %682 = vmatmul.bf16.gmra.mxu3 %v530_v14 }
 0x126   :  { %v388_v6 = vpop.f32.mrf.mxu0 }
 0x127   :  { %v477_v15 = vpop.f32.mrf.mxu1 }
 0x128   :  { %v478_v17 = vadd.f32 %v477_v15, %v388_v6 }
 0x12a   :  { %v523_v18 = vpack.c.bf16 %v478_v17, %v476_v16 }
 0x12c   :  { %647 = vmatmul.bf16.gmra.mxu2 %v523_v18 }
 0x12e   :  { %v391_v20 = vpop.f32.mrf.mxu0 }
 0x12f   :  { %v480_v22 = vpop.f32.mrf.mxu1  ;;  %v608_v23 = vpop.f32.mrf.mxu2 }
 0x130   :  { %v609_v21 = vadd.f32 %v1333_v19, %v608_v23  ;;  %v481_v27 = vadd.f32 %v480_v22, %v391_v20 }
 0x132   :  { %688 = vst [vmem:[%s1467_s4] sm:$0xff] %v609_v21 }
 0x136   :  { %v393_v24 = vpop.f32.mrf.mxu0 }
 0x137   :  { %v482_v25 = vpop.f32.mrf.mxu1  ;;  %v610_v26 = vpop.f32.mrf.mxu2 }
 0x138   :  { %v483_v28 = vadd.f32 %v482_v25, %v393_v24  ;;  %v611_v29 = vadd.f32 %v1333_v19, %v610_v26 }
 0x13a   :  { %689 = vst [vmem:[%s1467_s4 + $0x8] sm:$0xff] %v611_v29  ;;  %v524_v30 = vpack.c.bf16 %v483_v28, %v481_v27 }
 0x13c   :  { %652 = vmatmul.bf16.gmra.mxu2 %v524_v30 }
 0x13e   :  { %v396_v31 = vpop.f32.mrf.mxu0 }
 0x13f   :  { %v485_v32 = vpop.f32.mrf.mxu1  ;;  %v613_v33 = vpop.f32.mrf.mxu2 }
 0x140   :  { %v614_v34 = vadd.f32 %v1333_v19, %v613_v33  ;;  %v486_v38 = vadd.f32 %v485_v32, %v396_v31 }
 0x142   :  { %690 = vst [vmem:[%s1467_s4 + $0x10] sm:$0xff] %v614_v34 }
 0x146   :  { %v398_v35 = vpop.f32.mrf.mxu0 }
 0x147   :  { %v487_v36 = vpop.f32.mrf.mxu1  ;;  %v615_v37 = vpop.f32.mrf.mxu2 }
 0x148   :  { %v488_v39 = vadd.f32 %v487_v36, %v398_v35  ;;  %v616_v41 = vadd.f32 %v1333_v19, %v615_v37 }
 0x14a   :  { %691 = vst [vmem:[%s1467_s4 + $0x18] sm:$0xff] %v616_v41  ;;  %v525_v42 = vpack.c.bf16 %v488_v39, %v486_v38 }
 0x14c   :  { %657 = vmatmul.bf16.gmra.mxu2 %v525_v42 }
 0x14e   :  { %v401_v43 = vpop.f32.mrf.mxu0 }
 0x14f   :  { %v490_v44 = vpop.f32.mrf.mxu1  ;;  %v618_v45 = vpop.f32.mrf.mxu2 }
 0x150   :  { %v619_v46 = vadd.f32 %v1333_v19, %v618_v45  ;;  %v491_v51 = vadd.f32 %v490_v44, %v401_v43 }
 0x152   :  { %692 = vst [vmem:[%s1467_s4 + $0x20] sm:$0xff] %v619_v46 }
 0x156   :  { %v403_v47 = vpop.f32.mrf.mxu0 }
 0x157   :  { %v492_v48 = vpop.f32.mrf.mxu1  ;;  %v620_v49 = vpop.f32.mrf.mxu2 }
 0x158   :  { %v493_v52 = vadd.f32 %v492_v48, %v403_v47  ;;  %v621_v53 = vadd.f32 %v1333_v19, %v620_v49 }
 0x15a   :  { %693 = vst [vmem:[%s1467_s4 + $0x28] sm:$0xff] %v621_v53  ;;  %v526_v54 = vpack.c.bf16 %v493_v52, %v491_v51 }
 0x15c   :  { %662 = vmatmul.bf16.gmra.mxu2 %v526_v54 }
 0x15f   :  { %v623_v40 = vpop.f32.mrf.mxu2 }
 0x160   :  { %v624_v50 = vadd.f32 %v1333_v19, %v623_v40 }
 0x162   :  { %694 = vst [vmem:[%s1467_s4 + $0x30] sm:$0xff] %v624_v50 }
 0x167   :  { %v625_v56 = vpop.f32.mrf.mxu2 }
 0x168   :  { %v626_v57 = vadd.f32 %v1333_v19, %v625_v56 }
 0x16a   :  { %695 = vst [vmem:[%s1467_s4 + $0x38] sm:$0xff] %v626_v57 }
 0x16f   :  { %v628_v58 = vpop.f32.mrf.mxu2 }
 0x170   :  { %v629_v59 = vadd.f32 %v1333_v19, %v628_v58 }
 0x172   :  { %696 = vst [vmem:[%s1467_s4 + $0x40] sm:$0xff] %v629_v59 }
 0x174   :  { %v668_v60 = vpop.f32.mrf.mxu3 }
 0x175   :  { %v669_v61 = vadd.f32 %v1333_v19, %v668_v60 }
 0x177   :  { %712 = vst [vmem:[%s1467_s4 + $0xc0] sm:$0xff] %v669_v61  ;;  %v630_v62 = vpop.f32.mrf.mxu2 }
 0x178   :  { %v631_v63 = vadd.f32 %v1333_v19, %v630_v62 }
 0x17a   :  { %697 = vst [vmem:[%s1467_s4 + $0x48] sm:$0xff] %v631_v63 }
 0x17c   :  { %v670_v0 = vpop.f32.mrf.mxu3 }
 0x17d   :  { %v671_v2 = vadd.f32 %v1333_v19, %v670_v0 }
 0x17f   :  { %713 = vst [vmem:[%s1467_s4 + $0xc8] sm:$0xff] %v671_v2  ;;  %v633_v3 = vpop.f32.mrf.mxu2 }
 0x180   :  { %v634_v55 = vadd.f32 %v1333_v19, %v633_v3 }
 0x182   :  { %698 = vst [vmem:[%s1467_s4 + $0x50] sm:$0xff] %v634_v55 }
 0x184   :  { %v673_v1 = vpop.f32.mrf.mxu3 }
 0x185   :  { %v674_v4 = vadd.f32 %v1333_v19, %v673_v1 }
 0x187   :  { %714 = vst [vmem:[%s1467_s4 + $0xd0] sm:$0xff] %v674_v4  ;;  %v635_v5 = vpop.f32.mrf.mxu2 }
 0x188   :  { %v636_v7 = vadd.f32 %v1333_v19, %v635_v5 }
 0x18a   :  { %699 = vst [vmem:[%s1467_s4 + $0x58] sm:$0xff] %v636_v7 }
 0x18c   :  { %v675_v8 = vpop.f32.mrf.mxu3 }
 0x18d   :  { %v676_v9 = vadd.f32 %v1333_v19, %v675_v8 }
 0x18f   :  { %715 = vst [vmem:[%s1467_s4 + $0xd8] sm:$0xff] %v676_v9  ;;  %v638_v10 = vpop.f32.mrf.mxu2 }
 0x190   :  { %v639_v11 = vadd.f32 %v1333_v19, %v638_v10 }
 0x192   :  { %700 = vst [vmem:[%s1467_s4 + $0x60] sm:$0xff] %v639_v11 }
 0x194   :  { %v678_v12 = vpop.f32.mrf.mxu3 }
 0x195   :  { %v679_v13 = vadd.f32 %v1333_v19, %v678_v12 }
 0x197   :  { %716 = vst [vmem:[%s1467_s4 + $0xe0] sm:$0xff] %v679_v13  ;;  %v640_v14 = vpop.f32.mrf.mxu2 }
 0x198   :  { %v641_v6 = vadd.f32 %v1333_v19, %v640_v14 }
 0x19a   :  { %701 = vst [vmem:[%s1467_s4 + $0x68] sm:$0xff] %v641_v6 }
 0x19c   :  { %v680_v15 = vpop.f32.mrf.mxu3 }
 0x19d   :  { %v681_v16 = vadd.f32 %v1333_v19, %v680_v15 }
 0x19f   :  { %717 = vst [vmem:[%s1467_s4 + $0xe8] sm:$0xff] %v681_v16  ;;  %v643_v17 = vpop.f32.mrf.mxu2 }
 0x1a0   :  { %v644_v18 = vadd.f32 %v1333_v19, %v643_v17 }
 0x1a2   :  { %702 = vst [vmem:[%s1467_s4 + $0x70] sm:$0xff] %v644_v18 }
 0x1a4   :  { %v683_v20 = vpop.f32.mrf.mxu3 }
 0x1a5   :  { %v684_v22 = vadd.f32 %v1333_v19, %v683_v20 }
 0x1a7   :  { %718 = vst [vmem:[%s1467_s4 + $0xf0] sm:$0xff] %v684_v22  ;;  %v645_v23 = vpop.f32.mrf.mxu2 }
 0x1a8   :  { %v646_v21 = vadd.f32 %v1333_v19, %v645_v23 }
 0x1aa   :  { %703 = vst [vmem:[%s1467_s4 + $0x78] sm:$0xff] %v646_v21 }
 0x1ac   :  { %v685_v24 = vpop.f32.mrf.mxu3 }
 0x1ad   :  { %v686_v25 = vadd.f32 %v1333_v19, %v685_v24 }
 0x1af   :  { %719 = vst [vmem:[%s1467_s4 + $0xf8] sm:$0xff] %v686_v25  ;;  %v648_v26 = vpop.f32.mrf.mxu2 }
 0x1b0   :  { %v649_v27 = vadd.f32 %v1333_v19, %v648_v26 }
 0x1b2   :  { %704 = vst [vmem:[%s1467_s4 + $0x80] sm:$0xff] %v649_v27 }
 0x1b7   :  { %v650_v28 = vpop.f32.mrf.mxu2 }
 0x1b8   :  { %v651_v29 = vadd.f32 %v1333_v19, %v650_v28 }
 0x1ba   :  { %705 = vst [vmem:[%s1467_s4 + $0x88] sm:$0xff] %v651_v29 }
 0x1bf   :  { %v653_v30 = vpop.f32.mrf.mxu2 }
 0x1c0   :  { %v654_v31 = vadd.f32 %v1333_v19, %v653_v30 }
 0x1c2   :  { %706 = vst [vmem:[%s1467_s4 + $0x90] sm:$0xff] %v654_v31 }
 0x1c7   :  { %v655_v32 = vpop.f32.mrf.mxu2 }
 0x1c8   :  { %v656_v33 = vadd.f32 %v1333_v19, %v655_v32 }
 0x1ca   :  { %707 = vst [vmem:[%s1467_s4 + $0x98] sm:$0xff] %v656_v33 }
 0x1cf   :  { %v658_v34 = vpop.f32.mrf.mxu2 }
 0x1d0   :  { %v659_v35 = vadd.f32 %v1333_v19, %v658_v34 }
 0x1d2   :  { %708 = vst [vmem:[%s1467_s4 + $0xa0] sm:$0xff] %v659_v35 }
 0x1d7   :  { %v660_v36 = vpop.f32.mrf.mxu2 }
 0x1d8   :  { %v661_v37 = vadd.f32 %v1333_v19, %v660_v36 }
 0x1da   :  { %709 = vst [vmem:[%s1467_s4 + $0xa8] sm:$0xff] %v661_v37 }
 0x1df   :  { %v663_v38 = vpop.f32.mrf.mxu2 }
 0x1e0   :  { %v664_v39 = vadd.f32 %v1333_v19, %v663_v38 }
 0x1e2   :  { %710 = vst [vmem:[%s1467_s4 + $0xb0] sm:$0xff] %v664_v39 }
 0x1e7   :  { %v665_v41 = vpop.f32.mrf.mxu2 }
 0x1e8   :  { %v666_v42 = vadd.f32 %v1333_v19, %v665_v41 }
 0x1ea   :  { %711 = vst [vmem:[%s1467_s4 + $0xb8] sm:$0xff] %v666_v42 }

</bundles_post_ra>
